<compile_context>
chip_gen: v5e
topology: v5e:2x2
jax: 0.10.0
libtpu: 0.0.40
codegen_flags: <defaults>
</compile_context>

<pallas_src>
import functools

import jax
import jax.numpy as jnp
from jax import lax
from jax.experimental import pallas as pl
from jax.experimental.pallas import tpu as pltpu


# ---------------------------------------------------------------------------
# generation-aware VMEM budgets
# ---------------------------------------------------------------------------
def _vmem_capacity_bytes():
    try:
        return int(pltpu.get_tpu_info().vmem_capacity_bytes)
    except Exception:
        return 64 << 20            # conservative (v7x-sized) if query fails


def _vmem_limit(need_bytes, cap):
    """Explicit scoped-VMEM request: 2x margin, generation-aware ceiling."""
    hi = (40 << 20) if cap <= (64 << 20) else (100 << 20)
    return int(min(max(2 * int(need_bytes), 8 << 20), hi))


def _pick_block_rows(rows, width_elems, cap, force_small=False):
    """Largest power-of-two row block whose f32 working set fits the budget."""
    if force_small:
        return 8
    budget = (4 << 20) if cap <= (64 << 20) else (7 << 20)     # v7x vs v5e/v6e
    max_tm = max(8, budget // (4 * max(int(width_elems), 1)))
    tm = 8
    while tm * 2 <= max_tm and tm * 2 <= 4096 and tm < rows:
        tm *= 2
    return tm


# ---------------------------------------------------------------------------
# in-kernel helpers (group = the 4 (a,b) sub-positions of a ConvT output)
# ---------------------------------------------------------------------------
def _pool_group(v, group):
    """Pool a (1, group*cout) row vector over the `group` column blocks."""
    if group == 1:
        return v
    cout = v.shape[1] // group
    return sum(v[:, ab * cout:(ab + 1) * cout] for ab in range(group))


def _tile_group(v, group):
    if group == 1:
        return v
    return jnp.concatenate([v] * group, axis=1)


# ---------------------------------------------------------------------------
# kernels
# ---------------------------------------------------------------------------
def _fused_small_kernel(*refs, group, inv_n, eps, has_tail):
    """Whole layer resident in VMEM (single grid step): matmul -> batch-stat
    BN -> ReLU [-> block-diag tail matmul -> tanh].  No recompute, the pre-BN
    activation never leaves VMEM."""
    if has_tail:
        x_ref, w_ref, g_ref, b_ref, tw_ref, tb_ref, o_ref = refs
    else:
        x_ref, w_ref, g_ref, b_ref, o_ref = refs

    y = jnp.dot(x_ref[...], w_ref[...], preferred_element_type=jnp.float32)
    ps = _pool_group(jnp.sum(y, axis=0, keepdims=True), group)
    pq = _pool_group(jnp.sum(y * y, axis=0, keepdims=True), group)
    mean = ps * inv_n
    var = jnp.maximum(pq * inv_n - mean * mean, 0.0)   # robust to cancellation
    rstd = lax.rsqrt(var + eps)
    mean = _tile_group(mean, group)
    rstd = _tile_group(rstd, group)
    a = jnp.maximum((y - mean) * rstd * g_ref[...] + b_ref[...], 0.0)
    if has_tail:
        z = jnp.dot(a.astype(tw_ref.dtype), tw_ref[...],
                    preferred_element_type=jnp.float32) + tb_ref[...]
        o_ref[...] = jnp.tanh(z).astype(o_ref.dtype)
    else:
        o_ref[...] = a.astype(o_ref.dtype)


def _stats_kernel(x_ref, w_ref, sum_ref, ssq_ref, *, group):
    """Per-row-block partial per-channel sum / sum-of-squares of x @ w."""
    y = jnp.dot(x_ref[...], w_ref[...], preferred_element_type=jnp.float32)
    sum_ref[0] = _pool_group(jnp.sum(y, axis=0, keepdims=True), group)
    ssq_ref[0] = _pool_group(jnp.sum(y * y, axis=0, keepdims=True), group)


def _norm_kernel(*refs, has_tail):
    """Recompute the cheap matmul, apply the precomputed per-column
    scale/shift, ReLU, optionally chain the tail matmul + tanh."""
    if has_tail:
        x_ref, w_ref, sc_ref, sh_ref, tw_ref, tb_ref, o_ref = refs
    else:
        x_ref, w_ref, sc_ref, sh_ref, o_ref = refs
    y = jnp.dot(x_ref[...], w_ref[...], preferred_element_type=jnp.float32)
    a = jnp.maximum(y * sc_ref[...] + sh_ref[...], 0.0)
    if has_tail:
        z = jnp.dot(a.astype(tw_ref.dtype), tw_ref[...],
                    preferred_element_type=jnp.float32) + tb_ref[...]
        o_ref[...] = jnp.tanh(z).astype(o_ref.dtype)
    else:
        o_ref[...] = a.astype(o_ref.dtype)


# ---------------------------------------------------------------------------
# fused layer wrapper
# ---------------------------------------------------------------------------
def fused_layer(x, w, gamma, beta, group, tail=None, *,
                eps=1e-5, out_dtype=jnp.float32, force_blocked=False):
    """y = relu(batchnorm_train(x @ w)) [then tanh(y @ w_tail + b_tail)].

    x: (R, K) pixel matrix; w: (K, M) with M = group*Cout, columns ordered
    (group, Cout).  gamma/beta: (Cout,).  BN statistics are pooled over all R
    rows AND the `group` column blocks, i.e. exactly BatchNorm2d over the
    conv-transpose output (training-mode batch statistics).  The linear/conv
    bias is intentionally absent: a per-channel additive bias in front of
    training-mode BN cancels exactly.
    """
    R, K = x.shape
    M = w.shape[1]
    cout = M // group
    has_tail = tail is not None
    if has_tail:
        tw, tb = tail
        Mout = tw.shape[1]
    else:
        tw = tb = None
        Mout = M
    inv_n = 1.0 / float(R * group)
    cap = _vmem_capacity_bytes()
    tail_elems = (M * Mout + Mout) if has_tail else 0

    # --- path 1: whole layer resident in VMEM ------------------------------
    est = 4 * (2 * (R * K + K * M + 2 * M + tail_elems)
               + 2 * R * Mout + 2 * R * M)
    if (not force_blocked) and est <= int(0.35 * cap):
        g_t = jnp.tile(gamma.astype(jnp.float32), group).reshape(1, M)
        b_t = jnp.tile(beta.astype(jnp.float32), group).reshape(1, M)
        in_specs = [pl.BlockSpec((R, K), lambda i: (0, 0)),
                    pl.BlockSpec((K, M), lambda i: (0, 0)),
                    pl.BlockSpec((1, M), lambda i: (0, 0)),
                    pl.BlockSpec((1, M), lambda i: (0, 0))]
        args = [x, w, g_t, b_t]
        if has_tail:
            in_specs += [pl.BlockSpec((M, Mout), lambda i: (0, 0)),
                         pl.BlockSpec((1, Mout), lambda i: (0, 0))]
            args += [tw, tb]
        kernel = functools.partial(_fused_small_kernel, group=group,
                                   inv_n=inv_n, eps=eps, has_tail=has_tail)
        return pl.pallas_call(
            kernel,
            out_shape=jax.ShapeDtypeStruct((R, Mout), out_dtype),
            grid_spec=pltpu.PrefetchScalarGridSpec(
                num_scalar_prefetch=0, grid=(1,),
                in_specs=in_specs,
                out_specs=pl.BlockSpec((R, Mout), lambda i: (0, 0))),
            compiler_params=pltpu.CompilerParams(
                dimension_semantics=("arbitrary",),
                vmem_limit_bytes=_vmem_limit(est, cap)),
        )(*args)

    # --- path 2: row-blocked two-pass (stats + tiny XLA reduce + normalize),
    # both calls have the row axis "parallel" (megacore friendly) ------------
    tm = _pick_block_rows(R, K + 2 * M + Mout, cap, force_small=force_blocked)
    rp = ((R + tm - 1) // tm) * tm
    if rp != R:
        # zero rows are stats-neutral because the matmul has no bias
        x = jnp.pad(x, ((0, rp - R), (0, 0)))
    nb = rp // tm

    stats_need = 4 * (2 * tm * K + 2 * K * M + tm * M + 4 * cout)
    sums, ssqs = pl.pallas_call(
        functools.partial(_stats_kernel, group=group),
        out_shape=(jax.ShapeDtypeStruct((nb, 1, cout), jnp.float32),
                   jax.ShapeDtypeStruct((nb, 1, cout), jnp.float32)),
        grid_spec=pltpu.PrefetchScalarGridSpec(
            num_scalar_prefetch=0, grid=(nb,),
            in_specs=[pl.BlockSpec((tm, K), lambda i: (i, 0)),
                      pl.BlockSpec((K, M), lambda i: (0, 0))],
            out_specs=[pl.BlockSpec((1, 1, cout), lambda i: (i, 0, 0)),
                       pl.BlockSpec((1, 1, cout), lambda i: (i, 0, 0))]),
        compiler_params=pltpu.CompilerParams(
            dimension_semantics=("parallel",),
            vmem_limit_bytes=_vmem_limit(stats_need, cap)),
    )(x, w)

    # tiny per-channel reduction + scale/shift folding, done once in XLA
    mean = jnp.sum(sums, axis=(0, 1)) * inv_n
    var = jnp.maximum(jnp.sum(ssqs, axis=(0, 1)) * inv_n - mean * mean, 0.0)
    rstd = lax.rsqrt(var + eps)
    scale_c = gamma.astype(jnp.float32) * rstd
    shift_c = beta.astype(jnp.float32) - mean * scale_c
    sc = jnp.tile(scale_c, group).reshape(1, M)
    sh = jnp.tile(shift_c, group).reshape(1, M)

    in_specs = [pl.BlockSpec((tm, K), lambda i: (i, 0)),
                pl.BlockSpec((K, M), lambda i: (0, 0)),
                pl.BlockSpec((1, M), lambda i: (0, 0)),
                pl.BlockSpec((1, M), lambda i: (0, 0))]
    args = [x, w, sc, sh]
    if has_tail:
        in_specs += [pl.BlockSpec((M, Mout), lambda i: (0, 0)),
                     pl.BlockSpec((1, Mout), lambda i: (0, 0))]
        args += [tw, tb]
    norm_need = 4 * (2 * tm * K + 2 * K * M + 4 * M + tail_elems
                     + 2 * tm * M + 2 * tm * Mout)
    out = pl.pallas_call(
        functools.partial(_norm_kernel, has_tail=has_tail),
        out_shape=jax.ShapeDtypeStruct((rp, Mout), out_dtype),
        grid_spec=pltpu.PrefetchScalarGridSpec(
            num_scalar_prefetch=0, grid=(nb,),
            in_specs=in_specs,
            out_specs=pl.BlockSpec((tm, Mout), lambda i: (i, 0))),
        compiler_params=pltpu.CompilerParams(
            dimension_semantics=("parallel",),
            vmem_limit_bytes=_vmem_limit(norm_need, cap)),
    )(*args)
    return out[:R] if rp != R else out


# ---------------------------------------------------------------------------
# ConvTranspose2d(k=2, s=2) weight massaging
# ---------------------------------------------------------------------------
def _ct_w_mat(w_pt):
    """PyTorch ConvTranspose2d weight (Cin, Cout, 2, 2) -> (Cin, 4*Cout),
    columns ordered (a, b, cout) with cout fastest (a: +H, b: +W offset)."""
    cin, cout = w_pt.shape[0], w_pt.shape[1]
    return jnp.transpose(w_pt, (0, 2, 3, 1)).reshape(cin, 4 * cout)


def _tail_weights(w3_pt, b3, dim, dtype):
    """Fold the final ConvT(dim->3)+Tanh into a lane-dense (128-col)
    block-diagonal matmul applied to the (a2, b2, cout) columns of the
    previous layer; output columns are (a2, b2, a3, b3, c) in the first 48
    lanes, zero padding elsewhere."""
    w3m = _ct_w_mat(w3_pt)                          # (dim, 12), cols (a3,b3,c)
    m_in, m_out = 4 * dim, 128
    w_bd = jnp.zeros((m_in, m_out), jnp.float32)
    for ab in range(4):                             # ab = a2*2 + b2
        w_bd = w_bd.at[ab * dim:(ab + 1) * dim, ab * 12:(ab + 1) * 12].set(w3m)
    b_p = jnp.zeros((1, m_out), jnp.float32)
    b_p = b_p.at[0, :48].set(jnp.tile(b3.astype(jnp.float32), 16))
    return w_bd.astype(dtype), b_p


# ---------------------------------------------------------------------------
# Decoder forward (WAE / WGAN-GP CIFAR generator)
# ---------------------------------------------------------------------------
def decoder_forward(z, params, dim, act_dtype=jnp.float32, force_blocked=False):
    N = z.shape[0]
    C0 = 4 * dim
    cd = act_dtype

    # Permute Linear columns once (tiny weight) from (c, h*w) to (h*w, c) so
    # the fused output reshapes straight into the pixel matrix.
    lin_w = params["lin_w"].reshape(dim, C0, 16).transpose(0, 2, 1).reshape(dim, 16 * C0)
    perm = lambda v: v.reshape(C0, 16).T.reshape(-1)
    bn0_g, bn0_b = perm(params["bn0_g"]), perm(params["bn0_b"])
    # NOTE: lin_b / ct1_b / ct2_b cancel under training-mode BN -> not loaded.

    # Linear(dim -> 64*dim) + BN(batch stats) + ReLU            (fused)
    h = fused_layer(z.astype(cd), lin_w.astype(cd), bn0_g, bn0_b, group=1,
                    out_dtype=cd, force_blocked=force_blocked)   # (N, 16*C0)
    x = h.reshape(N * 16, C0)                                    # 4x4 pixels

    # ConvT(4d -> 2d) + BN + ReLU                                (fused)
    x = fused_layer(x, _ct_w_mat(params["ct1_w"]).astype(cd),
                    params["bn1_g"], params["bn1_b"], group=4,
                    out_dtype=cd, force_blocked=force_blocked)   # (N*16, 8d)
    x = x.reshape(N * 64, 2 * dim)                               # 8x8 pixels

    # ConvT(2d -> d) + BN + ReLU + ConvT(d -> 3) + Tanh          (fully fused)
    tail = _tail_weights(params["ct3_w"], params["ct3_b"], dim, cd)
    y = fused_layer(x, _ct_w_mat(params["ct2_w"]).astype(cd),
                    params["bn2_g"], params["bn2_b"], group=4, tail=tail,
                    out_dtype=jnp.float32,
                    force_blocked=force_blocked)                 # (N*64, 128)

    # y rows = (n, h1, w1, a1, b1); cols = (a2, b2, a3, b3, c) + zero pad.
    # H = h1*8 + a1*4 + a2*2 + a3,  W = w1*8 + b1*4 + b2*2 + b3.
    t = y.reshape(N, 4, 4, 2, 2, 128)[..., :48]
    t = t.reshape(N, 4, 4, 2, 2, 2, 2, 2, 2, 3)
    out = jnp.transpose(t, (0, 9, 1, 3, 5, 7, 2, 4, 6, 8)).reshape(N, 3, 32, 32)
    return out


# ---------------------------------------------------------------------------
# parameter init (PyTorch-style uniform)
# ---------------------------------------------------------------------------
def init_params(key, dim):
    ks = jax.random.split(key, 8)
    feat0 = 4 * 4 * 4 * dim

    def u(k, shape, fan_in):
        s = 1.0 / float(fan_in) ** 0.5
        return jax.random.uniform(k, shape, jnp.float32, -s, s)

    return {
        "lin_w": u(ks[0], (dim, feat0), dim),      # stored (in, out) for x @ W
        "lin_b": u(ks[1], (feat0,), dim),          # cancels under batch-stat BN
        "bn0_g": jnp.ones((feat0,), jnp.float32),
        "bn0_b": jnp.zeros((feat0,), jnp.float32),
        "ct1_w": u(ks[2], (4 * dim, 2 * dim, 2, 2), 4 * dim * 4),
        "ct1_b": u(ks[3], (2 * dim,), 4 * dim * 4),
        "bn1_g": jnp.ones((2 * dim,), jnp.float32),
        "bn1_b": jnp.zeros((2 * dim,), jnp.float32),
        "ct2_w": u(ks[4], (2 * dim, dim, 2, 2), 2 * dim * 4),
        "ct2_b": u(ks[5], (dim,), 2 * dim * 4),
        "bn2_g": jnp.ones((dim,), jnp.float32),
        "bn2_b": jnp.zeros((dim,), jnp.float32),
        "ct3_w": u(ks[6], (dim, 3, 2, 2), dim * 4),
        "ct3_b": u(ks[7], (3,), dim * 4),
    }


if __name__ == "__main__":
    dim = 8        # args.dim
    batch = 2
    key = jax.random.PRNGKey(0)
    kz, kp = jax.random.split(key)
    z = jax.random.normal(kz, (batch, dim), jnp.float32)     # latent input
    params = init_params(kp, dim)

    fwd = jax.jit(functools.partial(decoder_forward, dim=dim))
    out = jax.block_until_ready(fwd(z, params))
    assert out.shape == (batch, 3, 32, 32), out.shape
    assert bool(jnp.all(jnp.isfinite(out)))
    assert bool(jnp.all(jnp.abs(out) <= 1.0)), "tanh range violated"

    # Exercise the row-blocked (stats + normalize, "parallel") path too and
    # check it agrees with the VMEM-resident single-pass path.
    fwd_blk = jax.jit(functools.partial(decoder_forward, dim=dim,
                                        force_blocked=True))
    out_blk = jax.block_until_ready(fwd_blk(z, params))
    assert out_blk.shape == out.shape
    assert bool(jnp.allclose(out, out_blk, atol=5e-3, rtol=0.0))

    print("KERNEL_OK")
</pallas_src>

<mosaic_0001>
module attributes {stable_mosaic.version = 11 : i64} {
  func.func @_fused_small_kernel(%arg0: i32, %arg1: memref<2x8xf32, #tpu.memory_space<vmem>>, %arg2: memref<8x512xf32, #tpu.memory_space<vmem>>, %arg3: memref<1x512xf32, #tpu.memory_space<vmem>>, %arg4: memref<1x512xf32, #tpu.memory_space<vmem>>, %arg5: memref<2x512xf32, #tpu.memory_space<vmem>>) attributes {dimension_semantics = [#tpu.dimension_semantics<arbitrary>], iteration_bounds = array<i64: 1>, scalar_prefetch = 0 : i64, scratch_operands = 0 : i64, tpu.core_type = #tpu.core_type<tc>, window_params = [{pipeline_mode = #tpu.pipeline_mode<synchronous>, transform_indices = @transform_0, window_bounds = array<i64: 2, 8>}, {pipeline_mode = #tpu.pipeline_mode<synchronous>, transform_indices = @transform_1, window_bounds = array<i64: 8, 512>}, {pipeline_mode = #tpu.pipeline_mode<synchronous>, transform_indices = @transform_2, window_bounds = array<i64: 1, 512>}, {pipeline_mode = #tpu.pipeline_mode<synchronous>, transform_indices = @transform_3, window_bounds = array<i64: 1, 512>}, {pipeline_mode = #tpu.pipeline_mode<synchronous>, transform_indices = @transform_4, window_bounds = array<i64: 2, 512>}]} {
    %c0 = arith.constant 0 : index
    %c0_0 = arith.constant 0 : index
    %0 = vector.load %arg1[%c0, %c0_0] : memref<2x8xf32, #tpu.memory_space<vmem>>, vector<2x8xf32>
    %c0_1 = arith.constant 0 : index
    %c0_2 = arith.constant 0 : index
    %1 = vector.load %arg2[%c0_1, %c0_2] : memref<8x512xf32, #tpu.memory_space<vmem>>, vector<8x512xf32>
    %cst = arith.constant dense<0.000000e+00> : vector<2x512xf32>
    %2 = tpu.matmul %0, %1, %cst {dimension_numbers = #tpu.dot_dimension_numbers<[1], [0], [0], [1], [0, 0, 1, 1], [], []>} : vector<2x8xf32>, vector<8x512xf32>, vector<2x512xf32> -> vector<2x512xf32>
    %cst_3 = arith.constant dense<0.000000e+00> : vector<512xf32>
    %3 = vector.multi_reduction <add>, %2, %cst_3 [0] : vector<2x512xf32> to vector<512xf32>
    %4 = vector.shape_cast %3 : vector<512xf32> to vector<1x512xf32>
    %5 = arith.mulf %2, %2 : vector<2x512xf32>
    %cst_4 = arith.constant dense<0.000000e+00> : vector<512xf32>
    %6 = vector.multi_reduction <add>, %5, %cst_4 [0] : vector<2x512xf32> to vector<512xf32>
    %7 = vector.shape_cast %6 : vector<512xf32> to vector<1x512xf32>
    %cst_5 = arith.constant 5.000000e-01 : f32
    %8 = vector.broadcast %cst_5 : f32 to vector<1x512xf32>
    %9 = arith.mulf %4, %8 : vector<1x512xf32>
    %cst_6 = arith.constant 5.000000e-01 : f32
    %10 = vector.broadcast %cst_6 : f32 to vector<1x512xf32>
    %11 = arith.mulf %7, %10 : vector<1x512xf32>
    %12 = arith.mulf %9, %9 : vector<1x512xf32>
    %13 = arith.subf %11, %12 : vector<1x512xf32>
    %cst_7 = arith.constant 0.000000e+00 : f32
    %14 = vector.broadcast %cst_7 : f32 to vector<1x512xf32>
    %15 = arith.maximumf %13, %14 : vector<1x512xf32>
    %cst_8 = arith.constant 9.99999974E-6 : f32
    %16 = vector.broadcast %cst_8 : f32 to vector<1x512xf32>
    %17 = arith.addf %15, %16 : vector<1x512xf32>
    %18 = math.rsqrt %17 : vector<1x512xf32>
    %19 = vector.broadcast %9 : vector<1x512xf32> to vector<2x512xf32>
    %20 = arith.subf %2, %19 : vector<2x512xf32>
    %21 = vector.broadcast %18 : vector<1x512xf32> to vector<2x512xf32>
    %22 = arith.mulf %20, %21 : vector<2x512xf32>
    %c0_9 = arith.constant 0 : index
    %c0_10 = arith.constant 0 : index
    %23 = vector.load %arg3[%c0_9, %c0_10] : memref<1x512xf32, #tpu.memory_space<vmem>>, vector<1x512xf32>
    %24 = vector.broadcast %23 : vector<1x512xf32> to vector<2x512xf32>
    %25 = arith.mulf %22, %24 : vector<2x512xf32>
    %c0_11 = arith.constant 0 : index
    %c0_12 = arith.constant 0 : index
    %26 = vector.load %arg4[%c0_11, %c0_12] : memref<1x512xf32, #tpu.memory_space<vmem>>, vector<1x512xf32>
    %27 = vector.broadcast %26 : vector<1x512xf32> to vector<2x512xf32>
    %28 = arith.addf %25, %27 : vector<2x512xf32>
    %cst_13 = arith.constant 0.000000e+00 : f32
    %29 = vector.broadcast %cst_13 : f32 to vector<2x512xf32>
    %30 = arith.maximumf %28, %29 : vector<2x512xf32>
    %c0_14 = arith.constant 0 : index
    %c0_15 = arith.constant 0 : index
    %31 = vector.load %arg5[%c0_14, %c0_15] : memref<2x512xf32, #tpu.memory_space<vmem>>, vector<2x512xf32>
    tpu.vector_store %arg5[%c0_14, %c0_15], %30 {strides = array<i32>} : memref<2x512xf32, #tpu.memory_space<vmem>>, vector<2x512xf32>,
    return
  }
  func.func @transform_0(%arg0: i32) -> (i32, i32) {
    %c0_i32 = arith.constant 0 : i32
    %c0_i32_0 = arith.constant 0 : i32
    %c0_i32_1 = arith.constant 0 : i32
    return %c0_i32, %c0_i32_0 : i32, i32
  }
  func.func @transform_1(%arg0: i32) -> (i32, i32) {
    %c0_i32 = arith.constant 0 : i32
    %c0_i32_0 = arith.constant 0 : i32
    %c0_i32_1 = arith.constant 0 : i32
    return %c0_i32, %c0_i32_0 : i32, i32
  }
  func.func @transform_2(%arg0: i32) -> (i32, i32) {
    %c0_i32 = arith.constant 0 : i32
    %c0_i32_0 = arith.constant 0 : i32
    %c0_i32_1 = arith.constant 0 : i32
    return %c0_i32, %c0_i32_0 : i32, i32
  }
  func.func @transform_3(%arg0: i32) -> (i32, i32) {
    %c0_i32 = arith.constant 0 : i32
    %c0_i32_0 = arith.constant 0 : i32
    %c0_i32_1 = arith.constant 0 : i32
    return %c0_i32, %c0_i32_0 : i32, i32
  }
  func.func @transform_4(%arg0: i32) -> (i32, i32) {
    %c0_i32 = arith.constant 0 : i32
    %c0_i32_0 = arith.constant 0 : i32
    %c0_i32_1 = arith.constant 0 : i32
    return %c0_i32, %c0_i32_0 : i32, i32
  }
}

module attributes {stable_mosaic.version = 11 : i64} {
  func.func @_fused_small_kernel(%arg0: i32, %arg1: memref<32x32xf32, #tpu.memory_space<vmem>>, %arg2: memref<32x64xf32, #tpu.memory_space<vmem>>, %arg3: memref<1x64xf32, #tpu.memory_space<vmem>>, %arg4: memref<1x64xf32, #tpu.memory_space<vmem>>, %arg5: memref<32x64xf32, #tpu.memory_space<vmem>>) attributes {dimension_semantics = [#tpu.dimension_semantics<arbitrary>], iteration_bounds = array<i64: 1>, scalar_prefetch = 0 : i64, scratch_operands = 0 : i64, tpu.core_type = #tpu.core_type<tc>, window_params = [{pipeline_mode = #tpu.pipeline_mode<synchronous>, transform_indices = @transform_0, window_bounds = array<i64: 32, 32>}, {pipeline_mode = #tpu.pipeline_mode<synchronous>, transform_indices = @transform_1, window_bounds = array<i64: 32, 64>}, {pipeline_mode = #tpu.pipeline_mode<synchronous>, transform_indices = @transform_2, window_bounds = array<i64: 1, 64>}, {pipeline_mode = #tpu.pipeline_mode<synchronous>, transform_indices = @transform_3, window_bounds = array<i64: 1, 64>}, {pipeline_mode = #tpu.pipeline_mode<synchronous>, transform_indices = @transform_4, window_bounds = array<i64: 32, 64>}]} {
    %c0 = arith.constant 0 : index
    %c0_0 = arith.constant 0 : index
    %0 = vector.load %arg1[%c0, %c0_0] : memref<32x32xf32, #tpu.memory_space<vmem>>, vector<32x32xf32>
    %c0_1 = arith.constant 0 : index
    %c0_2 = arith.constant 0 : index
    %1 = vector.load %arg2[%c0_1, %c0_2] : memref<32x64xf32, #tpu.memory_space<vmem>>, vector<32x64xf32>
    %cst = arith.constant dense<0.000000e+00> : vector<32x64xf32>
    %2 = tpu.matmul %0, %1, %cst {dimension_numbers = #tpu.dot_dimension_numbers<[1], [0], [0], [1], [0, 0, 1, 1], [], []>} : vector<32x32xf32>, vector<32x64xf32>, vector<32x64xf32> -> vector<32x64xf32>
    %cst_3 = arith.constant dense<0.000000e+00> : vector<64xf32>
    %3 = vector.multi_reduction <add>, %2, %cst_3 [0] : vector<32x64xf32> to vector<64xf32>
    %4 = vector.shape_cast %3 : vector<64xf32> to vector<1x64xf32>
    %5 = vector.extract_strided_slice %4 {offsets = [0, 0], sizes = [1, 16], strides = [1, 1]} : vector<1x64xf32> to vector<1x16xf32>
    %cst_4 = arith.constant 0.000000e+00 : f32
    %6 = vector.broadcast %cst_4 : f32 to vector<1x16xf32>
    %7 = arith.addf %6, %5 : vector<1x16xf32>
    %8 = vector.extract_strided_slice %4 {offsets = [0, 16], sizes = [1, 16], strides = [1, 1]} : vector<1x64xf32> to vector<1x16xf32>
    %9 = arith.addf %7, %8 : vector<1x16xf32>
    %10 = vector.extract_strided_slice %4 {offsets = [0, 32], sizes = [1, 16], strides = [1, 1]} : vector<1x64xf32> to vector<1x16xf32>
    %11 = arith.addf %9, %10 : vector<1x16xf32>
    %12 = vector.extract_strided_slice %4 {offsets = [0, 48], sizes = [1, 16], strides = [1, 1]} : vector<1x64xf32> to vector<1x16xf32>
    %13 = arith.addf %11, %12 : vector<1x16xf32>
    %14 = arith.mulf %2, %2 : vector<32x64xf32>
    %cst_5 = arith.constant dense<0.000000e+00> : vector<64xf32>
    %15 = vector.multi_reduction <add>, %14, %cst_5 [0] : vector<32x64xf32> to vector<64xf32>
    %16 = vector.shape_cast %15 : vector<64xf32> to vector<1x64xf32>
    %17 = vector.extract_strided_slice %16 {offsets = [0, 0], sizes = [1, 16], strides = [1, 1]} : vector<1x64xf32> to vector<1x16xf32>
    %cst_6 = arith.constant 0.000000e+00 : f32
    %18 = vector.broadcast %cst_6 : f32 to vector<1x16xf32>
    %19 = arith.addf %18, %17 : vector<1x16xf32>
    %20 = vector.extract_strided_slice %16 {offsets = [0, 16], sizes = [1, 16], strides = [1, 1]} : vector<1x64xf32> to vector<1x16xf32>
    %21 = arith.addf %19, %20 : vector<1x16xf32>
    %22 = vector.extract_strided_slice %16 {offsets = [0, 32], sizes = [1, 16], strides = [1, 1]} : vector<1x64xf32> to vector<1x16xf32>
    %23 = arith.addf %21, %22 : vector<1x16xf32>
    %24 = vector.extract_strided_slice %16 {offsets = [0, 48], sizes = [1, 16], strides = [1, 1]} : vector<1x64xf32> to vector<1x16xf32>
    %25 = arith.addf %23, %24 : vector<1x16xf32>
    %cst_7 = arith.constant 7.812500e-03 : f32
    %26 = vector.broadcast %cst_7 : f32 to vector<1x16xf32>
    %27 = arith.mulf %13, %26 : vector<1x16xf32>
    %cst_8 = arith.constant 7.812500e-03 : f32
    %28 = vector.broadcast %cst_8 : f32 to vector<1x16xf32>
    %29 = arith.mulf %25, %28 : vector<1x16xf32>
    %30 = arith.mulf %27, %27 : vector<1x16xf32>
    %31 = arith.subf %29, %30 : vector<1x16xf32>
    %cst_9 = arith.constant 0.000000e+00 : f32
    %32 = vector.broadcast %cst_9 : f32 to vector<1x16xf32>
    %33 = arith.maximumf %31, %32 : vector<1x16xf32>
    %cst_10 = arith.constant 9.99999974E-6 : f32
    %34 = vector.broadcast %cst_10 : f32 to vector<1x16xf32>
    %35 = arith.addf %33, %34 : vector<1x16xf32>
    %36 = math.rsqrt %35 : vector<1x16xf32>
    %37 = tpu.concatenate %27, %27, %27, %27 in 1 : vector<1x16xf32>, vector<1x16xf32>, vector<1x16xf32>, vector<1x16xf32> -> vector<1x64xf32>
    %38 = tpu.concatenate %36, %36, %36, %36 in 1 : vector<1x16xf32>, vector<1x16xf32>, vector<1x16xf32>, vector<1x16xf32> -> vector<1x64xf32>
    %39 = vector.broadcast %37 : vector<1x64xf32> to vector<32x64xf32>
    %40 = arith.subf %2, %39 : vector<32x64xf32>
    %41 = vector.broadcast %38 : vector<1x64xf32> to vector<32x64xf32>
    %42 = arith.mulf %40, %41 : vector<32x64xf32>
    %c0_11 = arith.constant 0 : index
    %c0_12 = arith.constant 0 : index
    %43 = vector.load %arg3[%c0_11, %c0_12] : memref<1x64xf32, #tpu.memory_space<vmem>>, vector<1x64xf32>
    %44 = vector.broadcast %43 : vector<1x64xf32> to vector<32x64xf32>
    %45 = arith.mulf %42, %44 : vector<32x64xf32>
    %c0_13 = arith.constant 0 : index
    %c0_14 = arith.constant 0 : index
    %46 = vector.load %arg4[%c0_13, %c0_14] : memref<1x64xf32, #tpu.memory_space<vmem>>, vector<1x64xf32>
    %47 = vector.broadcast %46 : vector<1x64xf32> to vector<32x64xf32>
    %48 = arith.addf %45, %47 : vector<32x64xf32>
    %cst_15 = arith.constant 0.000000e+00 : f32
    %49 = vector.broadcast %cst_15 : f32 to vector<32x64xf32>
    %50 = arith.maximumf %48, %49 : vector<32x64xf32>
    %c0_16 = arith.constant 0 : index
    %c0_17 = arith.constant 0 : index
    %51 = vector.load %arg5[%c0_16, %c0_17] : memref<32x64xf32, #tpu.memory_space<vmem>>, vector<32x64xf32>
    tpu.vector_store %arg5[%c0_16, %c0_17], %50 {strides = array<i32>} : memref<32x64xf32, #tpu.memory_space<vmem>>, vector<32x64xf32>,
    return
  }
  func.func @transform_0(%arg0: i32) -> (i32, i32) {
    %c0_i32 = arith.constant 0 : i32
    %c0_i32_0 = arith.constant 0 : i32
    %c0_i32_1 = arith.constant 0 : i32
    return %c0_i32, %c0_i32_0 : i32, i32
  }
  func.func @transform_1(%arg0: i32) -> (i32, i32) {
    %c0_i32 = arith.constant 0 : i32
    %c0_i32_0 = arith.constant 0 : i32
    %c0_i32_1 = arith.constant 0 : i32
    return %c0_i32, %c0_i32_0 : i32, i32
  }
  func.func @transform_2(%arg0: i32) -> (i32, i32) {
    %c0_i32 = arith.constant 0 : i32
    %c0_i32_0 = arith.constant 0 : i32
    %c0_i32_1 = arith.constant 0 : i32
    return %c0_i32, %c0_i32_0 : i32, i32
  }
  func.func @transform_3(%arg0: i32) -> (i32, i32) {
    %c0_i32 = arith.constant 0 : i32
    %c0_i32_0 = arith.constant 0 : i32
    %c0_i32_1 = arith.constant 0 : i32
    return %c0_i32, %c0_i32_0 : i32, i32
  }
  func.func @transform_4(%arg0: i32) -> (i32, i32) {
    %c0_i32 = arith.constant 0 : i32
    %c0_i32_0 = arith.constant 0 : i32
    %c0_i32_1 = arith.constant 0 : i32
    return %c0_i32, %c0_i32_0 : i32, i32
  }
}

module attributes {stable_mosaic.version = 11 : i64} {
  func.func @_fused_small_kernel(%arg0: i32, %arg1: memref<128x16xf32, #tpu.memory_space<vmem>>, %arg2: memref<16x32xf32, #tpu.memory_space<vmem>>, %arg3: memref<1x32xf32, #tpu.memory_space<vmem>>, %arg4: memref<1x32xf32, #tpu.memory_space<vmem>>, %arg5: memref<32x128xf32, #tpu.memory_space<vmem>>, %arg6: memref<1x128xf32, #tpu.memory_space<vmem>>, %arg7: memref<128x128xf32, #tpu.memory_space<vmem>>) attributes {dimension_semantics = [#tpu.dimension_semantics<arbitrary>], iteration_bounds = array<i64: 1>, scalar_prefetch = 0 : i64, scratch_operands = 0 : i64, tpu.core_type = #tpu.core_type<tc>, window_params = [{pipeline_mode = #tpu.pipeline_mode<synchronous>, transform_indices = @transform_0, window_bounds = array<i64: 128, 16>}, {pipeline_mode = #tpu.pipeline_mode<synchronous>, transform_indices = @transform_1, window_bounds = array<i64: 16, 32>}, {pipeline_mode = #tpu.pipeline_mode<synchronous>, transform_indices = @transform_2, window_bounds = array<i64: 1, 32>}, {pipeline_mode = #tpu.pipeline_mode<synchronous>, transform_indices = @transform_3, window_bounds = array<i64: 1, 32>}, {pipeline_mode = #tpu.pipeline_mode<synchronous>, transform_indices = @transform_4, window_bounds = array<i64: 32, 128>}, {pipeline_mode = #tpu.pipeline_mode<synchronous>, transform_indices = @transform_5, window_bounds = array<i64: 1, 128>}, {pipeline_mode = #tpu.pipeline_mode<synchronous>, transform_indices = @transform_6, window_bounds = array<i64: 128, 128>}]} {
    %c0 = arith.constant 0 : index
    %c0_0 = arith.constant 0 : index
    %0 = vector.load %arg1[%c0, %c0_0] : memref<128x16xf32, #tpu.memory_space<vmem>>, vector<128x16xf32>
    %c0_1 = arith.constant 0 : index
    %c0_2 = arith.constant 0 : index
    %1 = vector.load %arg2[%c0_1, %c0_2] : memref<16x32xf32, #tpu.memory_space<vmem>>, vector<16x32xf32>
    %cst = arith.constant dense<0.000000e+00> : vector<128x32xf32>
    %2 = tpu.matmul %0, %1, %cst {dimension_numbers = #tpu.dot_dimension_numbers<[1], [0], [0], [1], [0, 0, 1, 1], [], []>} : vector<128x16xf32>, vector<16x32xf32>, vector<128x32xf32> -> vector<128x32xf32>
    %cst_3 = arith.constant dense<0.000000e+00> : vector<32xf32>
    %3 = vector.multi_reduction <add>, %2, %cst_3 [0] : vector<128x32xf32> to vector<32xf32>
    %4 = vector.shape_cast %3 : vector<32xf32> to vector<1x32xf32>
    %5 = vector.extract_strided_slice %4 {offsets = [0, 0], sizes = [1, 8], strides = [1, 1]} : vector<1x32xf32> to vector<1x8xf32>
    %cst_4 = arith.constant 0.000000e+00 : f32
    %6 = vector.broadcast %cst_4 : f32 to vector<1x8xf32>
    %7 = arith.addf %6, %5 : vector<1x8xf32>
    %8 = vector.extract_strided_slice %4 {offsets = [0, 8], sizes = [1, 8], strides = [1, 1]} : vector<1x32xf32> to vector<1x8xf32>
    %9 = arith.addf %7, %8 : vector<1x8xf32>
    %10 = vector.extract_strided_slice %4 {offsets = [0, 16], sizes = [1, 8], strides = [1, 1]} : vector<1x32xf32> to vector<1x8xf32>
    %11 = arith.addf %9, %10 : vector<1x8xf32>
    %12 = vector.extract_strided_slice %4 {offsets = [0, 24], sizes = [1, 8], strides = [1, 1]} : vector<1x32xf32> to vector<1x8xf32>
    %13 = arith.addf %11, %12 : vector<1x8xf32>
    %14 = arith.mulf %2, %2 : vector<128x32xf32>
    %cst_5 = arith.constant dense<0.000000e+00> : vector<32xf32>
    %15 = vector.multi_reduction <add>, %14, %cst_5 [0] : vector<128x32xf32> to vector<32xf32>
    %16 = vector.shape_cast %15 : vector<32xf32> to vector<1x32xf32>
    %17 = vector.extract_strided_slice %16 {offsets = [0, 0], sizes = [1, 8], strides = [1, 1]} : vector<1x32xf32> to vector<1x8xf32>
    %cst_6 = arith.constant 0.000000e+00 : f32
    %18 = vector.broadcast %cst_6 : f32 to vector<1x8xf32>
    %19 = arith.addf %18, %17 : vector<1x8xf32>
    %20 = vector.extract_strided_slice %16 {offsets = [0, 8], sizes = [1, 8], strides = [1, 1]} : vector<1x32xf32> to vector<1x8xf32>
    %21 = arith.addf %19, %20 : vector<1x8xf32>
    %22 = vector.extract_strided_slice %16 {offsets = [0, 16], sizes = [1, 8], strides = [1, 1]} : vector<1x32xf32> to vector<1x8xf32>
    %23 = arith.addf %21, %22 : vector<1x8xf32>
    %24 = vector.extract_strided_slice %16 {offsets = [0, 24], sizes = [1, 8], strides = [1, 1]} : vector<1x32xf32> to vector<1x8xf32>
    %25 = arith.addf %23, %24 : vector<1x8xf32>
    %cst_7 = arith.constant 0.001953125 : f32
    %26 = vector.broadcast %cst_7 : f32 to vector<1x8xf32>
    %27 = arith.mulf %13, %26 : vector<1x8xf32>
    %cst_8 = arith.constant 0.001953125 : f32
    %28 = vector.broadcast %cst_8 : f32 to vector<1x8xf32>
    %29 = arith.mulf %25, %28 : vector<1x8xf32>
    %30 = arith.mulf %27, %27 : vector<1x8xf32>
    %31 = arith.subf %29, %30 : vector<1x8xf32>
    %cst_9 = arith.constant 0.000000e+00 : f32
    %32 = vector.broadcast %cst_9 : f32 to vector<1x8xf32>
    %33 = arith.maximumf %31, %32 : vector<1x8xf32>
    %cst_10 = arith.constant 9.99999974E-6 : f32
    %34 = vector.broadcast %cst_10 : f32 to vector<1x8xf32>
    %35 = arith.addf %33, %34 : vector<1x8xf32>
    %36 = math.rsqrt %35 : vector<1x8xf32>
    %37 = tpu.concatenate %27, %27, %27, %27 in 1 : vector<1x8xf32>, vector<1x8xf32>, vector<1x8xf32>, vector<1x8xf32> -> vector<1x32xf32>
    %38 = tpu.concatenate %36, %36, %36, %36 in 1 : vector<1x8xf32>, vector<1x8xf32>, vector<1x8xf32>, vector<1x8xf32> -> vector<1x32xf32>
    %39 = vector.broadcast %37 : vector<1x32xf32> to vector<128x32xf32>
    %40 = arith.subf %2, %39 : vector<128x32xf32>
    %41 = vector.broadcast %38 : vector<1x32xf32> to vector<128x32xf32>
    %42 = arith.mulf %40, %41 : vector<128x32xf32>
    %c0_11 = arith.constant 0 : index
    %c0_12 = arith.constant 0 : index
    %43 = vector.load %arg3[%c0_11, %c0_12] : memref<1x32xf32, #tpu.memory_space<vmem>>, vector<1x32xf32>
    %44 = vector.broadcast %43 : vector<1x32xf32> to vector<128x32xf32>
    %45 = arith.mulf %42, %44 : vector<128x32xf32>
    %c0_13 = arith.constant 0 : index
    %c0_14 = arith.constant 0 : index
    %46 = vector.load %arg4[%c0_13, %c0_14] : memref<1x32xf32, #tpu.memory_space<vmem>>, vector<1x32xf32>
    %47 = vector.broadcast %46 : vector<1x32xf32> to vector<128x32xf32>
    %48 = arith.addf %45, %47 : vector<128x32xf32>
    %cst_15 = arith.constant 0.000000e+00 : f32
    %49 = vector.broadcast %cst_15 : f32 to vector<128x32xf32>
    %50 = arith.maximumf %48, %49 : vector<128x32xf32>
    %c0_16 = arith.constant 0 : index
    %c0_17 = arith.constant 0 : index
    %51 = vector.load %arg5[%c0_16, %c0_17] : memref<32x128xf32, #tpu.memory_space<vmem>>, vector<32x128xf32>
    %cst_18 = arith.constant dense<0.000000e+00> : vector<128x128xf32>
    %52 = tpu.matmul %50, %51, %cst_18 {dimension_numbers = #tpu.dot_dimension_numbers<[1], [0], [0], [1], [0, 0, 1, 1], [], []>} : vector<128x32xf32>, vector<32x128xf32>, vector<128x128xf32> -> vector<128x128xf32>
    %c0_19 = arith.constant 0 : index
    %c0_20 = arith.constant 0 : index
    %53 = vector.load %arg6[%c0_19, %c0_20] : memref<1x128xf32, #tpu.memory_space<vmem>>, vector<1x128xf32>
    %54 = vector.broadcast %53 : vector<1x128xf32> to vector<128x128xf32>
    %55 = arith.addf %52, %54 : vector<128x128xf32>
    %56 = math.tanh %55 : vector<128x128xf32>
    %c0_21 = arith.constant 0 : index
    %c0_22 = arith.constant 0 : index
    %57 = vector.load %arg7[%c0_21, %c0_22] : memref<128x128xf32, #tpu.memory_space<vmem>>, vector<128x128xf32>
    tpu.vector_store %arg7[%c0_21, %c0_22], %56 {strides = array<i32>} : memref<128x128xf32, #tpu.memory_space<vmem>>, vector<128x128xf32>,
    return
  }
  func.func @transform_0(%arg0: i32) -> (i32, i32) {
    %c0_i32 = arith.constant 0 : i32
    %c0_i32_0 = arith.constant 0 : i32
    %c0_i32_1 = arith.constant 0 : i32
    return %c0_i32, %c0_i32_0 : i32, i32
  }
  func.func @transform_1(%arg0: i32) -> (i32, i32) {
    %c0_i32 = arith.constant 0 : i32
    %c0_i32_0 = arith.constant 0 : i32
    %c0_i32_1 = arith.constant 0 : i32
    return %c0_i32, %c0_i32_0 : i32, i32
  }
  func.func @transform_2(%arg0: i32) -> (i32, i32) {
    %c0_i32 = arith.constant 0 : i32
    %c0_i32_0 = arith.constant 0 : i32
    %c0_i32_1 = arith.constant 0 : i32
    return %c0_i32, %c0_i32_0 : i32, i32
  }
  func.func @transform_3(%arg0: i32) -> (i32, i32) {
    %c0_i32 = arith.constant 0 : i32
    %c0_i32_0 = arith.constant 0 : i32
    %c0_i32_1 = arith.constant 0 : i32
    return %c0_i32, %c0_i32_0 : i32, i32
  }
  func.func @transform_4(%arg0: i32) -> (i32, i32) {
    %c0_i32 = arith.constant 0 : i32
    %c0_i32_0 = arith.constant 0 : i32
    %c0_i32_1 = arith.constant 0 : i32
    return %c0_i32, %c0_i32_0 : i32, i32
  }
  func.func @transform_5(%arg0: i32) -> (i32, i32) {
    %c0_i32 = arith.constant 0 : i32
    %c0_i32_0 = arith.constant 0 : i32
    %c0_i32_1 = arith.constant 0 : i32
    return %c0_i32, %c0_i32_0 : i32, i32
  }
  func.func @transform_6(%arg0: i32) -> (i32, i32) {
    %c0_i32 = arith.constant 0 : i32
    %c0_i32_0 = arith.constant 0 : i32
    %c0_i32_1 = arith.constant 0 : i32
    return %c0_i32, %c0_i32_0 : i32, i32
  }
}

</mosaic_0001>

<bundles_post_ra>
// kernel: tile.34
= control target key start
LH: loop header
LB: loop body
LE: loop exit
PB: predicated region body
PF: predicated region fallthrough
CT: control target
= control target key end

     0   :  { %s37_s8 = smov 16   ;;  %s38_s9 = smov 32   ;;  %vm7_vm0 = vcmask 130048   ;;  %vm13_vm1 = vcmask 523648   ;;  %vm19_vm2 = vcmask 392448   ;;  %vm25_vm3 = vcmask 261248   ;;  %s55_s0 = inlined_call_operand.vmem [shape: f32[4,16], index: 0, kind: input, shape index: {}]   ;;  %s56_s1 = inlined_call_operand.vmem [shape: f32[1,64], index: 1, kind: output, shape index: {}]  }
   0x1   :  { %v4_v0 = vld [vmem:[%s55_s0] sm:$0xf]  ;;  %s36_s0 = smov 48  }
   0x2   :  { %5 = vst [vmem:[#allocation1] sm:$0xf] %v4_v0 }
   0x9   :  { %v10_v1 = vld [vmem:[#allocation1 + $0x3] sm:$0x1]   ;;  %v22_v2 = vld [vmem:[#allocation1 + $0x1] sm:$0x1]   ;;  %v16_v3 = vld [vmem:[#allocation1 + $0x2] sm:$0x1]  }
   0xa   :  { %11 = vrot.lane.b32.xlu0 %v10_v1, %s36_s0  ;;  %23 = vrot.lane.b32.xlu1 %v22_v2, %s37_s8  ;;  %v6_v4 = vld [vmem:[#allocation1] sm:$0x1]  }
   0xb   :  { %8 = vst.msk [vmem:[#allocation0] sm:$0x1] %vm7_vm0, %v6_v4  }
  0x12   :  { %17 = vrot.lane.b32.xlu0 %v16_v3, %s38_s9 }
  0x7c   :  { %v12_v5 = vpop.permute.xlu0 %11   ;;  %v24_v6 = vpop.permute.xlu1 %23  }
  0x7d   :  { %14 = vst.msk [vmem:[#allocation0] sm:$0x1] %vm13_vm1, %v12_v5  }
  0x84   :  { %v18_v7 = vpop.permute.xlu0 %17  }
  0x85   :  { %20 = vst.msk [vmem:[#allocation0] sm:$0x1] %vm19_vm2, %v18_v7  }
  0x86   :  { %26 = vst.msk [vmem:[#allocation0] sm:$0x1] %vm25_vm3, %v24_v6  }
  0x8d   :  { %v29_v8 = vld [vmem:[#allocation0] sm:$0x1] }
  0x8e   :  { %32 = vst [vmem:[%s56_s1] sm:$0x1] %v29_v8 }

// kernel: tile.33
= control target key start
LH: loop header
LB: loop body
LE: loop exit
PB: predicated region body
PF: predicated region fallthrough
CT: control target
= control target key end

     0   :  { %2 = vsyncpa [#allocation1], 0  ;;  %s48_s8 = smov [#allocation0]   ;;  %s65_s0 = inlined_call_operand.hbm [shape: f32[16], index: 0, kind: input, shape index: {}]   ;;  %s66_s1 = inlined_call_operand.vmem [shape: f32[4,16], index: 1, kind: output, shape index: {}]  }
   0x1   :  { %s8_s0 = sshll.u32 %s65_s0, 4  ;;  %s10_s9 = sshll.u32 %s48_s8, 4  ;;  %s9_s0 = int_to_ptr.hbm [resolvable:$true] %s8_s0  ;;  %s11_s9 = int_to_ptr.vmem [resolvable:$true] %s10_s9 }
   0x2   :  { %13 = dma.hbm_to_vmem [thread:$0]  %s9_s0, 16, %s11_s9, [#allocation1]  }
   0x3   :  { %46 = dma.done.wait [#allocation1], 16  }
   0x4   :  { %47 = vsyncadd [#allocation1], 4294967280  ;;  %v18_v0 = vld [vmem:[#allocation0] ss:$0 sm:$0xff] }
   0x5   :  { %19 = vst [vmem:[%s66_s1] sm:$0xf] %v18_v0 }
   0x6   :  { %20 = vsyncpa [#allocation1], 1 }

// kernel: tile.48
= control target key start
LH: loop header
LB: loop body
LE: loop exit
PB: predicated region body
PF: predicated region fallthrough
CT: control target
= control target key end

     0   :  { %2 = vsyncpa [#allocation1], 0  ;;  %s48_s8 = smov [#allocation0]   ;;  %s65_s0 = inlined_call_operand.hbm [shape: f32[8], index: 0, kind: input, shape index: {}]   ;;  %s66_s1 = inlined_call_operand.vmem [shape: f32[4,8], index: 1, kind: output, shape index: {}]  }
   0x1   :  { %s8_s0 = sshll.u32 %s65_s0, 4  ;;  %s10_s9 = sshll.u32 %s48_s8, 4  ;;  %s9_s0 = int_to_ptr.hbm [resolvable:$true] %s8_s0  ;;  %s11_s9 = int_to_ptr.vmem [resolvable:$true] %s10_s9 }
   0x2   :  { %13 = dma.hbm_to_vmem [thread:$0]  %s9_s0, 16, %s11_s9, [#allocation1]  }
   0x3   :  { %46 = dma.done.wait [#allocation1], 16  }
   0x4   :  { %47 = vsyncadd [#allocation1], 4294967280  ;;  %v18_v0 = vld [vmem:[#allocation0] ss:$0 sm:$0xff] }
   0x5   :  { %19 = vst [vmem:[%s66_s1] sm:$0xf] %v18_v0 }
   0x6   :  { %20 = vsyncpa [#allocation1], 1 }

// kernel: tile.49
= control target key start
LH: loop header
LB: loop body
LE: loop exit
PB: predicated region body
PF: predicated region fallthrough
CT: control target
= control target key end

     0   :  { %s37_s8 = smov 8   ;;  %s38_s9 = smov 16   ;;  %vm7_vm0 = vcmask 64512   ;;  %vm13_vm1 = vcmask 261312   ;;  %vm19_vm2 = vcmask 195712   ;;  %vm25_vm3 = vcmask 130112   ;;  %s55_s0 = inlined_call_operand.vmem [shape: f32[4,8], index: 0, kind: input, shape index: {}]   ;;  %s56_s1 = inlined_call_operand.vmem [shape: f32[1,32], index: 1, kind: output, shape index: {}]  }
   0x1   :  { %v4_v0 = vld [vmem:[%s55_s0] sm:$0xf]  ;;  %s36_s0 = smov 24  }
   0x2   :  { %5 = vst [vmem:[#allocation1] sm:$0xf] %v4_v0 }
   0x9   :  { %v10_v1 = vld [vmem:[#allocation1 + $0x3] sm:$0x1]   ;;  %v22_v2 = vld [vmem:[#allocation1 + $0x1] sm:$0x1]   ;;  %v16_v3 = vld [vmem:[#allocation1 + $0x2] sm:$0x1]  }
   0xa   :  { %11 = vrot.lane.b32.xlu0 %v10_v1, %s36_s0  ;;  %23 = vrot.lane.b32.xlu1 %v22_v2, %s37_s8  ;;  %v6_v4 = vld [vmem:[#allocation1] sm:$0x1]  }
   0xb   :  { %8 = vst.msk [vmem:[#allocation0] sm:$0x1] %vm7_vm0, %v6_v4  }
  0x12   :  { %17 = vrot.lane.b32.xlu0 %v16_v3, %s38_s9 }
  0x7c   :  { %v12_v5 = vpop.permute.xlu0 %11   ;;  %v24_v6 = vpop.permute.xlu1 %23  }
  0x7d   :  { %14 = vst.msk [vmem:[#allocation0] sm:$0x1] %vm13_vm1, %v12_v5  }
  0x84   :  { %v18_v7 = vpop.permute.xlu0 %17  }
  0x85   :  { %20 = vst.msk [vmem:[#allocation0] sm:$0x1] %vm19_vm2, %v18_v7  }
  0x86   :  { %26 = vst.msk [vmem:[#allocation0] sm:$0x1] %vm25_vm3, %v24_v6  }
  0x8d   :  { %v29_v8 = vld [vmem:[#allocation0] sm:$0x1] }
  0x8e   :  { %32 = vst [vmem:[%s56_s1] sm:$0x1] %v29_v8 }

// kernel: decoder_forward.4
= control target key start
LH: loop header
LB: loop body
LE: loop exit
PB: predicated region body
PF: predicated region fallthrough
CT: control target
= control target key end

     0   :  { %vm25_vm0 = vcmask 261120   ;;  %vm67_vm1 = vcmask 523264   ;;  %s235_s30 = smov 96   ;;  %s236_s5 = smov 80   ;;  %vm152_vm5 = vcmask 130048   ;;  %vm155_vm6 = vcmask 392192   ;;  %s349_s1 = inlined_call_operand.vmem [shape: f32[32,64], index: 1, kind: input, shape index: {}]   ;;  %s350_s0 = inlined_call_operand.vmem [shape: f32[32,32], index: 0, kind: input, shape index: {}]   ;;  %s351_s2 = inlined_call_operand.vmem [shape: f32[1,64], index: 2, kind: input, shape index: {}]   ;;  %s352_s3 = inlined_call_operand.vmem [shape: f32[1,64], index: 3, kind: input, shape index: {}]   ;;  %s353_s4 = inlined_call_operand.vmem [shape: f32[32,64], index: 4, kind: output, shape index: {}]  }
   0x1   :  { %v24_v0 = vld [vmem:[%s349_s1 + $0x18] sm:$0xff]  ;;  %v23_v1 = vld [vmem:[%s349_s1 + $0x10] sm:$0xff]  ;;  %v22_v2 = vld [vmem:[%s349_s1 + $0x8] sm:$0xff]  ;;  %s237_s6 = smov 48   ;;  %s238_s7 = smov 32  }
   0x2   :  { %213 = vmatpush.msra.mxu2 %v24_v0  ;;  %214 = vmatpush.msra.mxu3 %v24_v0  ;;  %v21_v3 = vld [vmem:[%s349_s1] sm:$0xff]  ;;  %v19_v4 = vld [vmem:[%s350_s0 + $0x10] sm:$0xff]  ;;  %v20_v5 = vld [vmem:[%s350_s0 + $0x18] sm:$0xff]  ;;  %s239_s8 = smov 16  }
   0x3   :  { %50 = vmatpush.msra.mxu0 %v24_v0  ;;  %212 = vmatpush.msra.mxu1 %v24_v0  ;;  %v17_v6 = vld [vmem:[%s350_s0] sm:$0xff]  ;;  %v18_v7 = vld [vmem:[%s350_s0 + $0x8] sm:$0xff]  ;;  %s234_s0 = smov 112  }
   0x4   :  { %216 = vmatpush.msra.mxu2 %v23_v1  ;;  %217 = vmatpush.msra.mxu3 %v23_v1 }
   0x5   :  { %51 = vmatpush.msra.mxu0 %v23_v1  ;;  %215 = vmatpush.msra.mxu1 %v23_v1 }
   0x6   :  { %219 = vmatpush.msra.mxu2 %v22_v2  ;;  %220 = vmatpush.msra.mxu3 %v22_v2 }
   0x7   :  { %52 = vmatpush.msra.mxu0 %v22_v2  ;;  %218 = vmatpush.msra.mxu1 %v22_v2 }
   0x8   :  { %222 = vmatpush.msra.mxu2 %v21_v3  ;;  %223 = vmatpush.msra.mxu3 %v21_v3 }
   0x9   :  { %210 = vmatmul.msk.f32.vlgmr.msra.gmra.mxu2 %vm25_vm0, %v19_v4  ;;  %211 = vmatmul.msk.f32.vlgmr.msra.gmra.mxu3 %vm25_vm0, %v20_v5 }
   0xa   :  { %53 = vmatpush.msra.mxu0 %v21_v3  ;;  %221 = vmatpush.msra.mxu1 %v21_v3 }
   0xb   :  { %208 = vmatmul.msk.f32.vlgmr.msra.gmra.mxu0 %vm25_vm0, %v17_v6  ;;  %209 = vmatmul.msk.f32.vlgmr.msra.gmra.mxu1 %vm25_vm0, %v18_v7 }
  0x88   :  { %v293_v8 = vpop.f32.mrf.mxu0  ;;  %v295_v9 = vpop.f32.mrf.mxu1 }
  0x89   :  { %v68_v10 = vsel %vm67_vm1, %v293_v8, 0.0  ;;  %v95_v11 = vmul.f32 %v293_v8, %v293_v8  ;;  %v69_v12 = vsel %vm67_vm1, %v295_v9, 0.0  ;;  %v96_v13 = vmul.f32 %v295_v9, %v295_v9 }
  0x8a   :  { %v70_v14 = vadd.f32 %v69_v12, %v68_v10 }
  0x8b   :  { %v99_v15 = vsel %vm67_vm1, %v95_v11, 0.0  ;;  %v100_v16 = vsel %vm67_vm1, %v96_v13, 0.0 }
  0x8c   :  { %v101_v17 = vadd.f32 %v100_v16, %v99_v15  ;;  %v307_v18 = vpop.f32.mrf.mxu2  ;;  %v309_v19 = vpop.f32.mrf.mxu3 }
  0x8d   :  { %v71_v20 = vsel %vm67_vm1, %v307_v18, 0.0  ;;  %v97_v21 = vmul.f32 %v307_v18, %v307_v18  ;;  %v73_v22 = vsel %vm67_vm1, %v309_v19, 0.0  ;;  %v98_v23 = vmul.f32 %v309_v19, %v309_v19 }
  0x8e   :  { %v72_v24 = vadd.f32 %v71_v20, %v70_v14 }
  0x8f   :  { %v102_v25 = vsel %vm67_vm1, %v97_v21, 0.0  ;;  %v104_v26 = vsel %vm67_vm1, %v98_v23, 0.0 }
  0x90   :  { %v103_v27 = vadd.f32 %v102_v25, %v101_v17  ;;  %v74_v28 = vadd.f32 %v73_v22, %v72_v24  ;;  %v230_v24 = vld [vmem:[%s351_s2] ss:$0 sm:$0xff] }
  0x92   :  { %v75_v29 = vrot.slane %v74_v28, 4  ;;  %v105_v30 = vadd.f32 %v104_v26, %v103_v27  ;;  %v231_v26 = vld [vmem:[%s352_s3] ss:$0 sm:$0xff] }
  0x94   :  { %v76_v31 = vadd.f32 %v75_v29, %v74_v28  ;;  %v106_v32 = vrot.slane %v105_v30, 4 }
  0x96   :  { %v77_v33 = vrot.slane %v76_v31, 2  ;;  %v107_v34 = vadd.f32 %v106_v32, %v105_v30 }
  0x98   :  { %v78_v35 = vadd.f32 %v77_v33, %v76_v31  ;;  %v108_v36 = vrot.slane %v107_v34, 2 }
  0x9a   :  { %v79_v37 = vrot.slane %v78_v35, 1  ;;  %v109_v38 = vadd.f32 %v108_v36, %v107_v34 }
  0x9c   :  { %v80_v39 = vadd.f32 %v79_v37, %v78_v35  ;;  %v110_v40 = vrot.slane %v109_v38, 1 }
  0x9e   :  { %83 = vrot.lane.b32.xlu0 %v80_v39, %s234_s0  ;;  %v111_v41 = vadd.f32 %v110_v40, %v109_v38 }
  0xa0   :  { %118 = vrot.lane.b32.xlu2 %v111_v41, %s235_s30  ;;  %114 = vrot.lane.b32.xlu1 %v111_v41, %s234_s0 }
  0xa6   :  { %87 = vrot.lane.b32.xlu0 %v80_v39, %s235_s30 }
  0xa8   :  { %122 = vrot.lane.b32.xlu2 %v111_v41, %s236_s5  ;;  %91 = vrot.lane.b32.xlu1 %v80_v39, %s236_s5 }
  0xfa   :  { %v119_v42 = vpop.permute.xlu2 %118 }
 0x102   :  { %v123_v50 = vpop.permute.xlu2 %122 }
 0x110   :  { %v84_v43 = vpop.permute.xlu0 %83 }
 0x111   :  { %v86_v46 = vadd.f32 %v84_v43, %v80_v39 }
 0x112   :  { %v115_v44 = vpop.permute.xlu1 %114 }
 0x113   :  { %v117_v45 = vadd.f32 %v115_v44, %v111_v41 }
 0x115   :  { %v121_v47 = vadd.f32 %v119_v42, %v117_v45 }
 0x117   :  { %v125_v52 = vadd.f32 %v123_v50, %v121_v47 }
 0x118   :  { %v88_v48 = vpop.permute.xlu0 %87 }
 0x119   :  { %v90_v49 = vadd.f32 %v88_v48, %v86_v46  ;;  %v127_v55 = vmul.f32 0.0078125, %v125_v52 }
 0x11a   :  { %v92_v51 = vpop.permute.xlu1 %91 }
 0x11b   :  { %v94_v53 = vadd.f32 %v92_v51, %v90_v49 }
 0x11d   :  { %v126_v54 = vmul.f32 0.0078125, %v94_v53 }
 0x11f   :  { %v128_v56 = vmul.f32 %v126_v54, %v126_v54  ;;  %149 = vrot.lane.b32.xlu2 %v126_v54, %s237_s6  ;;  %146 = vrot.lane.b32.xlu1 %v126_v54, %s238_s7 }
 0x120   :  { %143 = vrot.lane.b32.xlu0 %v126_v54, %s239_s8 }
 0x121   :  { %v129_v57 = vsub.f32 %v127_v55, %v128_v56 }
 0x123   :  { %v130_v58 = vmax.f32 %v129_v57, 0.0 }
 0x125   :  { %v131_v59 = vadd.f32 1e-05, %v130_v58 }
 0x127   :  { %232 = vrsqrt.f32 %v131_v59  ;;  %vm138_vm3 = vweird.f32 %v131_v59 }
 0x12d   :  { %v233_v60 = vpop.eup %232 }
 0x12e   :  { %v133_v61 = vmul.f32 %v233_v60, %v131_v59  ;;  %vm139_vm2 = vweird.f32 %v233_v60 }
 0x12f   :  { %vm140_vm4 = vmor %vm138_vm3, %vm139_vm2 }
 0x130   :  { %v134_v62 = vmul.f32 %v233_v60, %v133_v61 }
 0x132   :  { %v135_v63 = vmul.f32 0.5, %v134_v62 }
 0x134   :  { %v136_v0 = vsub.f32 1.5, %v135_v63 }
 0x136   :  { %v137_v1 = vmul.f32 %v233_v60, %v136_v0 }
 0x138   :  { %v141_v2 = vsel %vm140_vm4, %v233_v60, %v137_v1 }
 0x139   :  { %164 = vrot.lane.b32.xlu2 %v141_v2, %s237_s6  ;;  %161 = vrot.lane.b32.xlu1 %v141_v2, %s238_s7 }
 0x13a   :  { %158 = vrot.lane.b32.xlu0 %v141_v2, %s239_s8 }
 0x179   :  { %v150_v7 = vpop.permute.xlu2 %149 }
 0x191   :  { %v147_v4 = vpop.permute.xlu1 %146 }
 0x192   :  { %v144_v3 = vpop.permute.xlu0 %143 }
 0x193   :  { %v153_v5 = vsel %vm152_vm5, %v126_v54, %v144_v3  ;;  %v165_v15 = vpop.permute.xlu2 %164 }
 0x194   :  { %v154_v6 = vsel %vm25_vm0, %v153_v5, %v147_v4 }
 0x195   :  { %v156_v10 = vsel %vm155_vm6, %v154_v6, %v150_v7 }
 0x196   :  { %v170_v11 = vperm.slane %v156_v10, 0 }
 0x198   :  { %v171_v17 = vsub.f32 %v293_v8, %v170_v11  ;;  %v172_v21 = vsub.f32 %v295_v9, %v170_v11  ;;  %v173_v22 = vsub.f32 %v307_v18, %v170_v11  ;;  %v174_v23 = vsub.f32 %v309_v19, %v170_v11 }
 0x1ab   :  { %v162_v12 = vpop.permute.xlu1 %161 }
 0x1ac   :  { %v159_v13 = vpop.permute.xlu0 %158 }
 0x1ad   :  { %v167_v14 = vsel %vm152_vm5, %v141_v2, %v159_v13 }
 0x1ae   :  { %v168_v16 = vsel %vm25_vm0, %v167_v14, %v162_v12 }
 0x1af   :  { %v169_v20 = vsel %vm155_vm6, %v168_v16, %v165_v15 }
 0x1b0   :  { %v175_v25 = vperm.slane %v169_v20, 0 }
 0x1b2   :  { %v176_v27 = vmul.f32 %v175_v25, %v171_v17  ;;  %v177_v28 = vmul.f32 %v175_v25, %v172_v21  ;;  %v178_v29 = vmul.f32 %v175_v25, %v173_v22  ;;  %v179_v8 = vmul.f32 %v175_v25, %v174_v23 }
 0x1b4   :  { %v184_v30 = vmul.f32 %v230_v24, %v176_v27  ;;  %v185_v31 = vmul.f32 %v230_v24, %v177_v28  ;;  %v186_v9 = vmul.f32 %v230_v24, %v178_v29  ;;  %v187_v32 = vmul.f32 %v230_v24, %v179_v8 }
 0x1b6   :  { %v192_v18 = vadd.f32 %v231_v26, %v184_v30  ;;  %v193_v33 = vadd.f32 %v231_v26, %v185_v31  ;;  %v194_v19 = vadd.f32 %v231_v26, %v186_v9  ;;  %v195_v34 = vadd.f32 %v231_v26, %v187_v32 }
 0x1b8   :  { %v196_v35 = vmax.f32 %v192_v18, 0.0  ;;  %v197_v36 = vmax.f32 %v193_v33, 0.0  ;;  %v198_v37 = vmax.f32 %v194_v19, 0.0  ;;  %v199_v38 = vmax.f32 %v195_v34, 0.0 }
 0x1ba   :  { %200 = vst.msk [vmem:[%s353_s4] sm:$0xff] %vm67_vm1, %v196_v35 }
 0x1bb   :  { %201 = vst.msk [vmem:[%s353_s4 + $0x8] sm:$0xff] %vm67_vm1, %v197_v36 }
 0x1bc   :  { %202 = vst.msk [vmem:[%s353_s4 + $0x10] sm:$0xff] %vm67_vm1, %v198_v37 }
 0x1bd   :  { %203 = vst.msk [vmem:[%s353_s4 + $0x18] sm:$0xff] %vm67_vm1, %v199_v38 }

// kernel: decoder_forward.3
= control target key start
LH: loop header
LB: loop body
LE: loop exit
PB: predicated region body
PF: predicated region fallthrough
CT: control target
= control target key end

     0   :  { %9 = vsyncpa [#allocation3], 0  ;;  %s343_s18 = smov [#allocation2]   ;;  %s452_s0 = inlined_call_operand.hbm [shape: f32[2,8], index: 0, kind: input, shape index: {}]   ;;  %s453_s1 = inlined_call_operand.vmem [shape: f32[8,512], index: 1, kind: input, shape index: {}]   ;;  %s454_s2 = inlined_call_operand.vmem [shape: f32[1,512], index: 2, kind: input, shape index: {}]   ;;  %s455_s3 = inlined_call_operand.vmem [shape: f32[1,512], index: 3, kind: input, shape index: {}]   ;;  %s456_s4 = inlined_call_operand.vmem [shape: f32[2,512], index: 4, kind: output, shape index: {}]  }
   0x1   :  { %s15_s17 = sshll.u32 %s452_s0, 4  ;;  %s17_s19 = sshll.u32 %s343_s18, 4  ;;  %s16_s17 = int_to_ptr.hbm [resolvable:$true] %s15_s17  ;;  %s18_s19 = int_to_ptr.vmem [resolvable:$true] %s17_s19 }
   0x2   :  { %20 = dma.hbm_to_vmem [thread:$0]  %s16_s17, 32, %s18_s19, [#allocation3]  }
   0x3   :  { %341 = dma.done.wait [#allocation3], 32  }
   0x4   :  { %342 = vsyncadd [#allocation3], 4294967264  ;;  %v32_v0 = vld [vmem:[%s453_s1] sm:$0xff]  ;;  %v33_v1 = vld [vmem:[%s453_s1 + $0x8] sm:$0xff]  ;;  %vm36_vm0 = vcmask 64512   ;;  %vm120_vm1 = vcmask 1041408  }
   0x5   :  { %v34_v2 = vld [vmem:[%s453_s1 + $0x10] sm:$0xff]  ;;  %55 = vmatpush.msra.mxu0 %v32_v0  ;;  %75 = vmatpush.msra.mxu1 %v33_v1  ;;  %v35_v3 = vld [vmem:[%s453_s1 + $0x18] sm:$0xff]  ;;  %v31_v4 = vld [vmem:[#allocation2] sm:$0x3]  ;;  %vm293_vm14 = vcmask 1045508   ;;  %vm295_vm15 = vcmask 1043456  }
   0x6   :  { %95 = vmatpush.msra.mxu2 %v34_v2  ;;  %115 = vmatpush.msra.mxu3 %v35_v3 }
   0x7   :  { %304 = vmatmul.msk.f32.vlgmr.msra.gmra.mxu0 %vm36_vm0, %v31_v4  ;;  %305 = vmatmul.msk.f32.vlgmr.msra.gmra.mxu1 %vm36_vm0, %v31_v4 }
   0x8   :  { %306 = vmatmul.msk.f32.vlgmr.msra.gmra.mxu2 %vm36_vm0, %v31_v4  ;;  %307 = vmatmul.msk.f32.vlgmr.msra.gmra.mxu3 %vm36_vm0, %v31_v4 }
  0x84   :  { %v384_v5 = vpop.f32.mrf.mxu0  ;;  %v386_v6 = vpop.f32.mrf.mxu1 }
  0x85   :  { %v121_v7 = vsel %vm120_vm1, %v384_v5, 0.0  ;;  %v149_v8 = vmul.f32 %v384_v5, %v384_v5  ;;  %v128_v9 = vsel %vm120_vm1, %v386_v6, 0.0  ;;  %v150_v10 = vmul.f32 %v386_v6, %v386_v6 }
  0x86   :  { %v122_v11 = vrot.slane %v121_v7, 4  ;;  %v129_v12 = vrot.slane %v128_v9, 4 }
  0x87   :  { %v153_v13 = vsel %vm120_vm1, %v149_v8, 0.0  ;;  %v160_v14 = vsel %vm120_vm1, %v150_v10, 0.0 }
  0x88   :  { %v123_v15 = vadd.f32 %v122_v11, %v121_v7  ;;  %v154_v16 = vrot.slane %v153_v13, 4  ;;  %v130_v17 = vadd.f32 %v129_v12, %v128_v9  ;;  %v161_v18 = vrot.slane %v160_v14, 4 }
  0x8a   :  { %v124_v19 = vrot.slane %v123_v15, 2  ;;  %v155_v20 = vadd.f32 %v154_v16, %v153_v13  ;;  %v131_v21 = vrot.slane %v130_v17, 2  ;;  %v162_v22 = vadd.f32 %v161_v18, %v160_v14 }
  0x8b   :  { %v398_v23 = vpop.f32.mrf.mxu2  ;;  %v400_v28 = vpop.f32.mrf.mxu3 }
  0x8c   :  { %v125_v24 = vadd.f32 %v124_v19, %v123_v15  ;;  %v156_v25 = vrot.slane %v155_v20, 2  ;;  %v132_v26 = vadd.f32 %v131_v21, %v130_v17  ;;  %v163_v27 = vrot.slane %v162_v22, 2 }
  0x8d   :  { %v135_v29 = vsel %vm120_vm1, %v398_v23, 0.0  ;;  %v151_v30 = vmul.f32 %v398_v23, %v398_v23  ;;  %v142_v37 = vsel %vm120_vm1, %v400_v28, 0.0  ;;  %v152_v38 = vmul.f32 %v400_v28, %v400_v28 }
  0x8e   :  { %v126_v31 = vrot.slane %v125_v24, 1  ;;  %v157_v32 = vadd.f32 %v156_v25, %v155_v20  ;;  %v133_v33 = vrot.slane %v132_v26, 1  ;;  %v164_v34 = vadd.f32 %v163_v27, %v162_v22 }
  0x8f   :  { %v136_v35 = vrot.slane %v135_v29, 4  ;;  %v167_v36 = vsel %vm120_vm1, %v151_v30, 0.0  ;;  %v143_v51 = vrot.slane %v142_v37, 4  ;;  %v174_v52 = vsel %vm120_vm1, %v152_v38, 0.0 }
  0x90   :  { %v127_v39 = vadd.f32 %v126_v31, %v125_v24  ;;  %v158_v40 = vrot.slane %v157_v32, 1  ;;  %v134_v41 = vadd.f32 %v133_v33, %v132_v26  ;;  %v165_v42 = vrot.slane %v164_v34, 1 }
  0x91   :  { %v137_v43 = vadd.f32 %v136_v35, %v135_v29  ;;  %v168_v44 = vrot.slane %v167_v36, 4  ;;  %v144_v60 = vadd.f32 %v143_v51, %v142_v37  ;;  %v175_v61 = vrot.slane %v174_v52, 4 }
  0x92   :  { %v159_v45 = vadd.f32 %v158_v40, %v157_v32  ;;  %v411_v46 = vmul.f32 0.5, %v127_v39  ;;  %v166_v47 = vadd.f32 %v165_v42, %v164_v34  ;;  %v413_v48 = vmul.f32 0.5, %v134_v41 }
  0x93   :  { %v138_v49 = vrot.slane %v137_v43, 2  ;;  %v169_v50 = vadd.f32 %v168_v44, %v167_v36  ;;  %v145_v2 = vrot.slane %v144_v60, 2  ;;  %v176_v3 = vadd.f32 %v175_v61, %v174_v52 }
  0x94   :  { %v185_v53 = vmul.f32 0.5, %v159_v45  ;;  %v189_v54 = vmul.f32 %v411_v46, %v411_v46  ;;  %v186_v55 = vmul.f32 0.5, %v166_v47  ;;  %v190_v56 = vmul.f32 %v413_v48, %v413_v48 }
  0x95   :  { %v139_v57 = vadd.f32 %v138_v49, %v137_v43  ;;  %v170_v58 = vrot.slane %v169_v50, 2  ;;  %v146_v10 = vadd.f32 %v145_v2, %v144_v60  ;;  %v177_v11 = vrot.slane %v176_v3, 2  ;;  %v253_v49 = vld [vmem:[%s454_s2] sm:$0xf] }
  0x96   :  { %v193_v59 = vsub.f32 %v185_v53, %v189_v54  ;;  %v194_v62 = vsub.f32 %v186_v55, %v190_v56  ;;  %v246_v52 = vsub.f32 %v386_v6, %v413_v48 }
  0x97   :  { %v140_v63 = vrot.slane %v139_v57, 1  ;;  %v171_v0 = vadd.f32 %v170_v58, %v169_v50  ;;  %v147_v15 = vrot.slane %v146_v10, 1  ;;  %v178_v16 = vadd.f32 %v177_v11, %v176_v3 }
  0x98   :  { %v197_v1 = vmax.f32 %v193_v59, 0.0  ;;  %v198_v4 = vmax.f32 %v194_v62, 0.0  ;;  %v267_v59 = vld [vmem:[%s455_s3] sm:$0xf]  ;;  %v255_v11 = vperm.slane %v253_v49, 0 }
  0x99   :  { %v141_v7 = vadd.f32 %v140_v63, %v139_v57  ;;  %v172_v8 = vrot.slane %v171_v0, 1  ;;  %v148_v19 = vadd.f32 %v147_v15, %v146_v10  ;;  %v179_v20 = vrot.slane %v178_v16, 1 }
  0x9a   :  { %v201_v9 = vadd.f32 1e-05, %v197_v1  ;;  %v202_v12 = vadd.f32 1e-05, %v198_v4  ;;  %v256_v57 = vperm.slane %v253_v49, 1  ;;  %v257_v63 = vperm.slane %v253_v49, 2 }
  0x9b   :  { %v173_v13 = vadd.f32 %v172_v8, %v171_v0  ;;  %v420_v14 = vmul.f32 0.5, %v141_v7  ;;  %v180_v22 = vadd.f32 %v179_v20, %v178_v16  ;;  %v424_v24 = vmul.f32 0.5, %v148_v19 }
  0x9c   :  { %309 = vrsqrt.f32 %v201_v9  ;;  %vm221_vm3 = vweird.f32 %v202_v12  ;;  %vm211_vm7 = vweird.f32 %v201_v9  ;;  %v245_v1 = vsub.f32 %v384_v5, %v411_v46 }
  0x9d   :  { %311 = vrsqrt.f32 %v202_v12  ;;  %v187_v17 = vmul.f32 0.5, %v173_v13  ;;  %v191_v18 = vmul.f32 %v420_v14, %v420_v14  ;;  %v188_v27 = vmul.f32 0.5, %v180_v22 }
  0x9e   :  { %v192_v29 = vmul.f32 %v424_v24, %v424_v24  ;;  %v247_v48 = vsub.f32 %v398_v23, %v420_v14  ;;  %v270_v3 = vperm.slane %v267_v59, 1  ;;  %v271_v8 = vperm.slane %v267_v59, 2 }
  0x9f   :  { %v195_v21 = vsub.f32 %v187_v17, %v191_v18  ;;  %v248_v23 = vsub.f32 %v400_v28, %v424_v24  ;;  %v258_v14 = vperm.slane %v253_v49, 3  ;;  %v269_v17 = vperm.slane %v267_v59, 0 }
  0xa0   :  { %v196_v34 = vsub.f32 %v188_v27, %v192_v29  ;;  %v272_v19 = vperm.slane %v267_v59, 3 }
  0xa1   :  { %v199_v25 = vmax.f32 %v195_v21, 0.0 }
  0xa2   :  { %v310_v26 = vpop.eup %309  ;;  %v200_v37 = vmax.f32 %v196_v34, 0.0 }
  0xa3   :  { %v312_v30 = vpop.eup %311  ;;  %v206_v31 = vmul.f32 %v310_v26, %v201_v9  ;;  %v203_v32 = vadd.f32 1e-05, %v199_v25  ;;  %vm212_vm5 = vweird.f32 %v310_v26 }
  0xa4   :  { %v216_v33 = vmul.f32 %v312_v30, %v202_v12  ;;  %v204_v39 = vadd.f32 1e-05, %v200_v37  ;;  %vm222_vm2 = vweird.f32 %v312_v30  ;;  %vm436_vm8 = vmor %vm211_vm7, %vm212_vm5 }
  0xa5   :  { %v207_v35 = vmul.f32 %v310_v26, %v206_v31  ;;  %313 = vrsqrt.f32 %v203_v32  ;;  %vm223_vm4 = vmor %vm221_vm3, %vm222_vm2  ;;  %vm231_vm9 = vweird.f32 %v203_v32 }
  0xa6   :  { %v217_v36 = vmul.f32 %v312_v30, %v216_v33  ;;  %315 = vrsqrt.f32 %v204_v39  ;;  %vm241_vm12 = vweird.f32 %v204_v39 }
  0xa7   :  { %v208_v40 = vmul.f32 0.5, %v207_v35 }
  0xa8   :  { %v218_v38 = vmul.f32 0.5, %v217_v36 }
  0xa9   :  { %v209_v45 = vsub.f32 1.5, %v208_v40 }
  0xaa   :  { %v219_v41 = vsub.f32 1.5, %v218_v38 }
  0xab   :  { %v314_v42 = vpop.eup %313  ;;  %v210_v54 = vmul.f32 %v310_v26, %v209_v45 }
  0xac   :  { %v220_v43 = vmul.f32 %v312_v30, %v219_v41  ;;  %v226_v44 = vmul.f32 %v314_v42, %v203_v32  ;;  %v316_v51 = vpop.eup %315  ;;  %vm232_vm6 = vweird.f32 %v314_v42 }
  0xad   :  { %v236_v55 = vmul.f32 %v316_v51, %v204_v39  ;;  %v214_v6 = vsel %vm436_vm8, %v310_v26, %v210_v54  ;;  %vm233_vm10 = vmor %vm231_vm9, %vm232_vm6  ;;  %vm242_vm11 = vweird.f32 %v316_v51 }
  0xae   :  { %v227_v47 = vmul.f32 %v314_v42, %v226_v44  ;;  %v224_v50 = vsel %vm223_vm4, %v312_v30, %v220_v43  ;;  %v249_v10 = vmul.f32 %v245_v1, %v214_v6  ;;  %vm243_vm13 = vmor %vm241_vm12, %vm242_vm11 }
  0xaf   :  { %v250_v56 = vmul.f32 %v246_v52, %v224_v50  ;;  %v237_v60 = vmul.f32 %v316_v51, %v236_v55 }
  0xb0   :  { %v228_v53 = vmul.f32 0.5, %v227_v47  ;;  %v263_v46 = vmul.f32 %v255_v11, %v249_v10 }
  0xb1   :  { %v238_v0 = vmul.f32 0.5, %v237_v60  ;;  %v264_v2 = vmul.f32 %v256_v57, %v250_v56 }
  0xb2   :  { %v229_v58 = vsub.f32 1.5, %v228_v53  ;;  %v277_v25 = vadd.f32 %v269_v17, %v263_v46 }
  0xb3   :  { %v239_v9 = vsub.f32 1.5, %v238_v0  ;;  %v278_v15 = vadd.f32 %v270_v3, %v264_v2 }
  0xb4   :  { %v230_v62 = vmul.f32 %v314_v42, %v229_v58  ;;  %v281_v31 = vmax.f32 %v277_v25, 0.0 }
  0xb5   :  { %v240_v13 = vmul.f32 %v316_v51, %v239_v9  ;;  %v282_v20 = vmax.f32 %v278_v15, 0.0 }
  0xb6   :  { %v234_v4 = vsel %vm233_vm10, %v314_v42, %v230_v62 }
  0xb7   :  { %v251_v7 = vmul.f32 %v247_v48, %v234_v4  ;;  %v244_v5 = vsel %vm243_vm13, %v316_v51, %v240_v13  ;;  %v289_v27 = vrot.slane %v282_v20, 6 }
  0xb8   :  { %v252_v18 = vmul.f32 %v248_v23, %v244_v5 }
  0xb9   :  { %v265_v12 = vmul.f32 %v257_v63, %v251_v7  ;;  %v292_v28 = vsel %vm120_vm1, %v281_v31, %v289_v27 }
  0xba   :  { %v266_v22 = vmul.f32 %v258_v14, %v252_v18 }
  0xbb   :  { %v279_v16 = vadd.f32 %v271_v8, %v265_v12 }
  0xbc   :  { %v280_v26 = vadd.f32 %v272_v19, %v266_v22 }
  0xbd   :  { %v283_v21 = vmax.f32 %v279_v16, 0.0 }
  0xbe   :  { %v284_v30 = vmax.f32 %v280_v26, 0.0 }
  0xbf   :  { %v290_v29 = vrot.slane %v283_v21, 4 }
  0xc0   :  { %v291_v32 = vrot.slane %v284_v30, 2 }
  0xc2   :  { %v294_v24 = vsel %vm293_vm14, %v290_v29, %v291_v32 }
  0xc3   :  { %v296_v33 = vsel %vm295_vm15, %v292_v28, %v294_v24 }
  0xc4   :  { %298 = vst [vmem:[%s456_s4] sm:$0xff] %v296_v33 }
  0xc5   :  { %303 = vsyncpa [#allocation3], 1 }

// kernel: decoder_forward.5
= control target key start
LH: loop header
LB: loop body
LE: loop exit
PB: predicated region body
PF: predicated region fallthrough
CT: control target
= control target key end

     0   :  { %vm41_vm0 = vcmask 130048   ;;  %vm155_vm1 = vcmask 261120   ;;  %s647_s7 = smov 112   ;;  %s648_s8 = smov 104   ;;  %vm300_vm5 = vcmask 64512   ;;  %vm303_vm6 = vcmask 195584   ;;  %s1062_s1 = inlined_call_operand.vmem [shape: f32[16,32], index: 1, kind: input, shape index: {}]   ;;  %s1063_s0 = inlined_call_operand.vmem [shape: f32[128,16], index: 0, kind: input, shape index: {}]   ;;  %s1064_s2 = inlined_call_operand.vmem [shape: f32[1,32], index: 2, kind: input, shape index: {}]   ;;  %s1065_s3 = inlined_call_operand.vmem [shape: f32[1,32], index: 3, kind: input, shape index: {}]   ;;  %s1066_s5 = inlined_call_operand.vmem [shape: f32[1,128], index: 5, kind: input, shape index: {}]   ;;  %s1067_s4 = inlined_call_operand.vmem [shape: f32[32,128], index: 4, kind: input, shape index: {}]   ;;  %s1068_s6 = inlined_call_operand.vmem [shape: f32[128,128], index: 6, kind: output, shape index: {}]  }
   0x1   :  { %v40_v0 = vld [vmem:[%s1062_s1 + $0x8] sm:$0xff]  ;;  %v39_v1 = vld [vmem:[%s1062_s1] sm:$0xff]  ;;  %v33_v5 = vld [vmem:[%s1063_s0 + $0x50] sm:$0xff]  ;;  %s649_s9 = smov 24   ;;  %s650_s10 = smov 16  }
   0x2   :  { %104 = vmatpush.msra.mxu0 %v40_v0  ;;  %v23_v2 = vld [vmem:[%s1063_s0] sm:$0xff]  ;;  %597 = vmatpush.msra.mxu3 %v40_v0  ;;  %v32_v3 = vld [vmem:[%s1063_s0 + $0x48] sm:$0xff]  ;;  %v25_v6 = vld [vmem:[%s1063_s0 + $0x10] sm:$0xff]  ;;  %s651_s11 = smov 8  }
   0x3   :  { %v24_v4 = vld [vmem:[%s1063_s0 + $0x8] sm:$0xff]  ;;  %v34_v7 = vld [vmem:[%s1063_s0 + $0x58] sm:$0xff]  ;;  %v35_v9 = vld [vmem:[%s1063_s0 + $0x60] sm:$0xff] }
   0x4   :  { %105 = vmatpush.msra.mxu0 %v39_v1  ;;  %598 = vmatpush.msra.mxu3 %v39_v1  ;;  %v26_v8 = vld [vmem:[%s1063_s0 + $0x18] sm:$0xff]  ;;  %v27_v10 = vld [vmem:[%s1063_s0 + $0x20] sm:$0xff]  ;;  %v36_v11 = vld [vmem:[%s1063_s0 + $0x68] sm:$0xff] }
   0x5   :  { %565 = vmatmul.msk.f32.vlgmr.msra.gmra.mxu0 %vm41_vm0, %v23_v2  ;;  %574 = vmatmul.msk.f32.vlgmr.msra.gmra.mxu3 %vm41_vm0, %v32_v3  ;;  %v28_v12 = vld [vmem:[%s1063_s0 + $0x28] sm:$0xff]  ;;  %v37_v13 = vld [vmem:[%s1063_s0 + $0x70] sm:$0xff]  ;;  %v38_v15 = vld [vmem:[%s1063_s0 + $0x78] sm:$0xff] }
   0x6   :  { %v29_v14 = vld [vmem:[%s1063_s0 + $0x30] sm:$0xff]  ;;  %v30_v16 = vld [vmem:[%s1063_s0 + $0x38] sm:$0xff]  ;;  %v31_v17 = vld [vmem:[%s1063_s0 + $0x40] sm:$0xff]  ;;  %s646_s0 = smov 120  }
   0xd   :  { %566 = vmatmul.msk.f32.gmra.mxu0 %vm41_vm0, %v24_v4  ;;  %575 = vmatmul.msk.f32.gmra.mxu3 %vm41_vm0, %v33_v5 }
  0x15   :  { %567 = vmatmul.msk.f32.gmra.mxu0 %vm41_vm0, %v25_v6  ;;  %576 = vmatmul.msk.f32.gmra.mxu3 %vm41_vm0, %v34_v7 }
  0x1d   :  { %568 = vmatmul.msk.f32.gmra.mxu0 %vm41_vm0, %v26_v8  ;;  %577 = vmatmul.msk.f32.gmra.mxu3 %vm41_vm0, %v35_v9 }
  0x25   :  { %569 = vmatmul.msk.f32.gmra.mxu0 %vm41_vm0, %v27_v10  ;;  %578 = vmatmul.msk.f32.gmra.mxu3 %vm41_vm0, %v36_v11 }
  0x2d   :  { %570 = vmatmul.msk.f32.gmra.mxu0 %vm41_vm0, %v28_v12  ;;  %579 = vmatmul.msk.f32.gmra.mxu3 %vm41_vm0, %v37_v13 }
  0x35   :  { %571 = vmatmul.msk.f32.gmra.mxu0 %vm41_vm0, %v29_v14  ;;  %580 = vmatmul.msk.f32.gmra.mxu3 %vm41_vm0, %v38_v15 }
  0x3d   :  { %572 = vmatmul.msk.f32.gmra.mxu0 %vm41_vm0, %v30_v16 }
  0x45   :  { %573 = vmatmul.msk.f32.gmra.mxu0 %vm41_vm0, %v31_v17 }
  0x82   :  { %v757_v18 = vpop.f32.mrf.mxu0 }
  0x83   :  { %v207_v30 = vmul.f32 %v757_v18, %v757_v18  ;;  %v156_v33 = vsel %vm155_vm1, %v757_v18, 0.0 }
  0x85   :  { %v223_v39 = vsel %vm155_vm1, %v207_v30, 0.0 }
  0x88   :  { %v761_v20 = vpop.f32.mrf.mxu3 }
  0x89   :  { %v216_v6 = vmul.f32 %v761_v20, %v761_v20  ;;  %v173_v11 = vsel %vm155_vm1, %v761_v20, 0.0 }
  0x8a   :  { %v759_v19 = vpop.f32.mrf.mxu0 }
  0x8b   :  { %v208_v28 = vmul.f32 %v759_v19, %v759_v19  ;;  %v157_v31 = vsel %vm155_vm1, %v759_v19, 0.0  ;;  %v240_v16 = vsel %vm155_vm1, %v216_v6, 0.0 }
  0x8c   :  { %v158_v37 = vadd.f32 %v157_v31, %v156_v33 }
  0x8d   :  { %v224_v34 = vsel %vm155_vm1, %v208_v28, 0.0 }
  0x8e   :  { %v225_v43 = vadd.f32 %v224_v34, %v223_v39 }
  0x90   :  { %v765_v22 = vpop.f32.mrf.mxu3 }
  0x91   :  { %v217_v12 = vmul.f32 %v765_v22, %v765_v22  ;;  %v175_v17 = vsel %vm155_vm1, %v765_v22, 0.0 }
  0x92   :  { %v763_v21 = vpop.f32.mrf.mxu0 }
  0x93   :  { %v209_v32 = vmul.f32 %v763_v21, %v763_v21  ;;  %v159_v35 = vsel %vm155_vm1, %v763_v21, 0.0 }
  0x94   :  { %v160_v44 = vadd.f32 %v159_v35, %v158_v37 }
  0x95   :  { %v226_v40 = vsel %vm155_vm1, %v209_v32, 0.0  ;;  %v242_v32 = vsel %vm155_vm1, %v217_v12, 0.0 }
  0x96   :  { %v227_v48 = vadd.f32 %v226_v40, %v225_v43 }
  0x98   :  { %v771_v25 = vpop.f32.mrf.mxu3 }
  0x99   :  { %v218_v28 = vmul.f32 %v771_v25, %v771_v25  ;;  %v177_v33 = vsel %vm155_vm1, %v771_v25, 0.0 }
  0x9a   :  { %v767_v23 = vpop.f32.mrf.mxu0 }
  0x9b   :  { %v210_v36 = vmul.f32 %v767_v23, %v767_v23  ;;  %v161_v41 = vsel %vm155_vm1, %v767_v23, 0.0  ;;  %v244_v39 = vsel %vm155_vm1, %v218_v28, 0.0 }
  0x9c   :  { %v162_v49 = vadd.f32 %v161_v41, %v160_v44 }
  0x9d   :  { %v228_v45 = vsel %vm155_vm1, %v210_v36, 0.0 }
  0x9e   :  { %v229_v54 = vadd.f32 %v228_v45, %v227_v48 }
  0xa0   :  { %v775_v27 = vpop.f32.mrf.mxu3 }
  0xa1   :  { %v219_v34 = vmul.f32 %v775_v27, %v775_v27  ;;  %v179_v40 = vsel %vm155_vm1, %v775_v27, 0.0 }
  0xa2   :  { %v769_v24 = vpop.f32.mrf.mxu0 }
  0xa3   :  { %v211_v42 = vmul.f32 %v769_v24, %v769_v24  ;;  %v163_v46 = vsel %vm155_vm1, %v769_v24, 0.0  ;;  %v246_v44 = vsel %vm155_vm1, %v219_v34, 0.0 }
  0xa4   :  { %v164_v55 = vadd.f32 %v163_v46, %v162_v49 }
  0xa5   :  { %v230_v51 = vsel %vm155_vm1, %v211_v42, 0.0 }
  0xa6   :  { %v231_v59 = vadd.f32 %v230_v51, %v229_v54 }
  0xa8   :  { %v794_v38 = vpop.f32.mrf.mxu3 }
  0xa9   :  { %v220_v41 = vmul.f32 %v794_v38, %v794_v38  ;;  %v181_v45 = vsel %vm155_vm1, %v794_v38, 0.0 }
  0xaa   :  { %v773_v26 = vpop.f32.mrf.mxu0 }
  0xab   :  { %v212_v47 = vmul.f32 %v773_v26, %v773_v26  ;;  %v165_v52 = vsel %vm155_vm1, %v773_v26, 0.0  ;;  %v248_v51 = vsel %vm155_vm1, %v220_v41, 0.0 }
  0xac   :  { %v166_v60 = vadd.f32 %v165_v52, %v164_v55 }
  0xad   :  { %v232_v56 = vsel %vm155_vm1, %v212_v47, 0.0 }
  0xae   :  { %v233_v63 = vadd.f32 %v232_v56, %v231_v59 }
  0xb0   :  { %v822_v1 = vpop.f32.mrf.mxu3 }
  0xb1   :  { %v221_v46 = vmul.f32 %v822_v1, %v822_v1  ;;  %v183_v52 = vsel %vm155_vm1, %v822_v1, 0.0 }
  0xb2   :  { %v779_v29 = vpop.f32.mrf.mxu0 }
  0xb3   :  { %v213_v53 = vmul.f32 %v779_v29, %v779_v29  ;;  %v167_v57 = vsel %vm155_vm1, %v779_v29, 0.0  ;;  %v250_v56 = vsel %vm155_vm1, %v221_v46, 0.0 }
  0xb4   :  { %v168_v0 = vadd.f32 %v167_v57, %v166_v60 }
  0xb5   :  { %v234_v61 = vsel %vm155_vm1, %v213_v53, 0.0 }
  0xb6   :  { %v235_v3 = vadd.f32 %v234_v61, %v233_v63 }
  0xb8   :  { %v848_v37 = vpop.f32.mrf.mxu3 }
  0xb9   :  { %v222_v47 = vmul.f32 %v848_v37, %v848_v37  ;;  %v185_v53 = vsel %vm155_vm1, %v848_v37, 0.0 }
  0xba   :  { %v807_v50 = vpop.f32.mrf.mxu0 }
  0xbb   :  { %v214_v58 = vmul.f32 %v807_v50, %v807_v50  ;;  %v169_v62 = vsel %vm155_vm1, %v807_v50, 0.0  ;;  %v252_v57 = vsel %vm155_vm1, %v222_v47, 0.0 }
  0xbc   :  { %v170_v4 = vadd.f32 %v169_v62, %v168_v0 }
  0xbd   :  { %v236_v2 = vsel %vm155_vm1, %v214_v58, 0.0 }
  0xbe   :  { %v237_v9 = vadd.f32 %v236_v2, %v235_v3 }
  0xc2   :  { %v825_v5 = vpop.f32.mrf.mxu0 }
  0xc3   :  { %v171_v7 = vsel %vm155_vm1, %v825_v5, 0.0  ;;  %v215_v8 = vmul.f32 %v825_v5, %v825_v5 }
  0xc4   :  { %v172_v10 = vadd.f32 %v171_v7, %v170_v4 }
  0xc5   :  { %v238_v13 = vsel %vm155_vm1, %v215_v8, 0.0 }
  0xc6   :  { %v174_v14 = vadd.f32 %v173_v11, %v172_v10  ;;  %v239_v15 = vadd.f32 %v238_v13, %v237_v9 }
  0xc8   :  { %v176_v30 = vadd.f32 %v175_v17, %v174_v14  ;;  %v241_v31 = vadd.f32 %v240_v16, %v239_v15 }
  0xca   :  { %v178_v35 = vadd.f32 %v177_v33, %v176_v30  ;;  %v243_v36 = vadd.f32 %v242_v32, %v241_v31 }
  0xcc   :  { %v245_v42 = vadd.f32 %v244_v39, %v243_v36  ;;  %v180_v43 = vadd.f32 %v179_v40, %v178_v35 }
  0xce   :  { %v182_v48 = vadd.f32 %v181_v45, %v180_v43  ;;  %v247_v49 = vadd.f32 %v246_v44, %v245_v42 }
  0xd0   :  { %v184_v54 = vadd.f32 %v183_v52, %v182_v48  ;;  %v249_v55 = vadd.f32 %v248_v51, %v247_v49  ;;  %v411_v49 = vld [vmem:[%s1067_s4 + $0x18] sm:$0xff]  ;;  %v410_v51 = vld [vmem:[%s1067_s4 + $0x10] sm:$0xff]  ;;  %v409_v52 = vld [vmem:[%s1067_s4 + $0x8] sm:$0xff] }
  0xd1   :  { %476 = vmatpush.msra.mxu1 %v411_v49  ;;  %599 = vmatpush.msra.mxu2 %v411_v49 }
  0xd2   :  { %v251_v58 = vadd.f32 %v250_v56, %v249_v55  ;;  %v186_v59 = vadd.f32 %v185_v53, %v184_v54  ;;  %v408_v53 = vld [vmem:[%s1067_s4] sm:$0xff] }
  0xd3   :  { %477 = vmatpush.msra.mxu1 %v410_v51  ;;  %600 = vmatpush.msra.mxu2 %v410_v51 }
  0xd4   :  { %v187_v60 = vrot.slane %v186_v59, 4  ;;  %v253_v61 = vadd.f32 %v252_v57, %v251_v58 }
  0xd5   :  { %478 = vmatpush.msra.mxu1 %v409_v52  ;;  %601 = vmatpush.msra.mxu2 %v409_v52 }
  0xd6   :  { %v188_v62 = vadd.f32 %v187_v60, %v186_v59  ;;  %v254_v63 = vrot.slane %v253_v61, 4 }
  0xd7   :  { %479 = vmatpush.msra.mxu1 %v408_v53  ;;  %602 = vmatpush.msra.mxu2 %v408_v53 }
  0xd8   :  { %v189_v0 = vrot.slane %v188_v62, 2  ;;  %v255_v2 = vadd.f32 %v254_v63, %v253_v61 }
  0xda   :  { %v190_v3 = vadd.f32 %v189_v0, %v188_v62  ;;  %v256_v4 = vrot.slane %v255_v2, 2 }
  0xdc   :  { %v191_v6 = vrot.slane %v190_v3, 1  ;;  %v257_v7 = vadd.f32 %v256_v4, %v255_v2 }
  0xde   :  { %v192_v8 = vadd.f32 %v191_v6, %v190_v3  ;;  %v258_v9 = vrot.slane %v257_v7, 1 }
  0xe0   :  { %195 = vrot.lane.b32.xlu0 %v192_v8, %s646_s0  ;;  %v259_v10 = vadd.f32 %v258_v9, %v257_v7  ;;  %v892_v7 = vld [vmem:[%s1064_s2] ss:$0 sm:$0xff] }
  0xe2   :  { %266 = vrot.lane.b32.xlu2 %v259_v10, %s647_s7  ;;  %262 = vrot.lane.b32.xlu1 %v259_v10, %s646_s0 }
  0xe8   :  { %199 = vrot.lane.b32.xlu0 %v192_v8, %s647_s7 }
  0xea   :  { %270 = vrot.lane.b32.xlu2 %v259_v10, %s648_s8  ;;  %203 = vrot.lane.b32.xlu1 %v192_v8, %s648_s8 }
 0x13c   :  { %v267_v11 = vpop.permute.xlu2 %266 }
 0x144   :  { %v271_v30 = vpop.permute.xlu2 %270 }
 0x152   :  { %v196_v12 = vpop.permute.xlu0 %195 }
 0x153   :  { %v198_v15 = vadd.f32 %v196_v12, %v192_v8 }
 0x154   :  { %v263_v13 = vpop.permute.xlu1 %262 }
 0x155   :  { %v265_v14 = vadd.f32 %v263_v13, %v259_v10  ;;  %v900_v10 = vld [vmem:[%s1065_s3] ss:$0 sm:$0xff] }
 0x157   :  { %v269_v16 = vadd.f32 %v267_v11, %v265_v14 }
 0x159   :  { %v273_v32 = vadd.f32 %v271_v30, %v269_v16 }
 0x15a   :  { %v200_v17 = vpop.permute.xlu0 %199 }
 0x15b   :  { %v202_v28 = vadd.f32 %v200_v17, %v198_v15  ;;  %v275_v35 = vmul.f32 0.001953125, %v273_v32 }
 0x15c   :  { %v204_v31 = vpop.permute.xlu1 %203 }
 0x15d   :  { %v206_v33 = vadd.f32 %v204_v31, %v202_v28 }
 0x15f   :  { %v274_v34 = vmul.f32 0.001953125, %v206_v33 }
 0x161   :  { %v276_v36 = vmul.f32 %v274_v34, %v274_v34  ;;  %297 = vrot.lane.b32.xlu2 %v274_v34, %s649_s9  ;;  %294 = vrot.lane.b32.xlu1 %v274_v34, %s650_s10 }
 0x162   :  { %291 = vrot.lane.b32.xlu0 %v274_v34, %s651_s11 }
 0x163   :  { %v277_v39 = vsub.f32 %v275_v35, %v276_v36 }
 0x165   :  { %v278_v40 = vmax.f32 %v277_v39, 0.0 }
 0x167   :  { %v279_v41 = vadd.f32 1e-05, %v278_v40 }
 0x169   :  { %612 = vrsqrt.f32 %v279_v41  ;;  %vm286_vm3 = vweird.f32 %v279_v41 }
 0x16f   :  { %v613_v42 = vpop.eup %612 }
 0x170   :  { %v281_v43 = vmul.f32 %v613_v42, %v279_v41  ;;  %vm287_vm2 = vweird.f32 %v613_v42 }
 0x171   :  { %vm288_vm4 = vmor %vm286_vm3, %vm287_vm2 }
 0x172   :  { %v282_v44 = vmul.f32 %v613_v42, %v281_v43 }
 0x174   :  { %v283_v45 = vmul.f32 0.5, %v282_v44 }
 0x176   :  { %v284_v46 = vsub.f32 1.5, %v283_v45 }
 0x178   :  { %v285_v47 = vmul.f32 %v613_v42, %v284_v46 }
 0x17a   :  { %v289_v48 = vsel %vm288_vm4, %v613_v42, %v285_v47 }
 0x17b   :  { %312 = vrot.lane.b32.xlu2 %v289_v48, %s649_s9  ;;  %309 = vrot.lane.b32.xlu1 %v289_v48, %s650_s10 }
 0x17c   :  { %306 = vrot.lane.b32.xlu0 %v289_v48, %s651_s11 }
 0x1bb   :  { %v298_v57 = vpop.permute.xlu2 %297 }
 0x1d3   :  { %v295_v55 = vpop.permute.xlu1 %294 }
 0x1d4   :  { %v292_v54 = vpop.permute.xlu0 %291 }
 0x1d5   :  { %v301_v56 = vsel %vm300_vm5, %v274_v34, %v292_v54  ;;  %v313_v0 = vpop.permute.xlu2 %312 }
 0x1d6   :  { %v302_v58 = vsel %vm41_vm0, %v301_v56, %v295_v55 }
 0x1d7   :  { %v304_v59 = vsel %vm303_vm6, %v302_v58, %v298_v57 }
 0x1d8   :  { %v882_v61 = vperm.slane %v304_v59, 0 }
 0x1da   :  { %v319_v6 = vsub.f32 %v757_v18, %v882_v61  ;;  %v327_v8 = vsub.f32 %v825_v5, %v882_v61  ;;  %v320_v18 = vsub.f32 %v759_v19, %v882_v61  ;;  %v328_v12 = vsub.f32 %v761_v20, %v882_v61 }
 0x1db   :  { %v321_v20 = vsub.f32 %v763_v21, %v882_v61  ;;  %v329_v32 = vsub.f32 %v765_v22, %v882_v61  ;;  %v322_v21 = vsub.f32 %v767_v23, %v882_v61  ;;  %v330_v22 = vsub.f32 %v771_v25, %v882_v61 }
 0x1dc   :  { %v323_v23 = vsub.f32 %v769_v24, %v882_v61  ;;  %v331_v25 = vsub.f32 %v775_v27, %v882_v61  ;;  %v324_v24 = vsub.f32 %v773_v26, %v882_v61  ;;  %v332_v27 = vsub.f32 %v794_v38, %v882_v61 }
 0x1dd   :  { %v325_v26 = vsub.f32 %v779_v29, %v882_v61  ;;  %v333_v38 = vsub.f32 %v822_v1, %v882_v61  ;;  %v326_v29 = vsub.f32 %v807_v50, %v882_v61  ;;  %v334_v1 = vsub.f32 %v848_v37, %v882_v61 }
 0x1ed   :  { %v310_v60 = vpop.permute.xlu1 %309 }
 0x1ee   :  { %v307_v62 = vpop.permute.xlu0 %306 }
 0x1ef   :  { %v315_v63 = vsel %vm300_vm5, %v289_v48, %v307_v62 }
 0x1f0   :  { %v316_v2 = vsel %vm41_vm0, %v315_v63, %v310_v60 }
 0x1f1   :  { %v317_v3 = vsel %vm303_vm6, %v316_v2, %v313_v0 }
 0x1f2   :  { %v885_v4 = vperm.slane %v317_v3, 0 }
 0x1f4   :  { %v336_v9 = vmul.f32 %v885_v4, %v319_v6  ;;  %v344_v11 = vmul.f32 %v885_v4, %v327_v8  ;;  %v337_v5 = vmul.f32 %v885_v4, %v320_v18  ;;  %v345_v15 = vmul.f32 %v885_v4, %v328_v12 }
 0x1f5   :  { %v338_v35 = vmul.f32 %v885_v4, %v321_v20  ;;  %v346_v36 = vmul.f32 %v885_v4, %v329_v32  ;;  %v339_v45 = vmul.f32 %v885_v4, %v322_v21  ;;  %v347_v46 = vmul.f32 %v885_v4, %v330_v22 }
 0x1f6   :  { %v356_v13 = vmul.f32 %v892_v7, %v336_v9  ;;  %v364_v14 = vmul.f32 %v892_v7, %v344_v11  ;;  %v357_v31 = vmul.f32 %v892_v7, %v337_v5  ;;  %v365_v19 = vmul.f32 %v892_v7, %v345_v15 }
 0x1f7   :  { %v358_v41 = vmul.f32 %v892_v7, %v338_v35  ;;  %v366_v42 = vmul.f32 %v892_v7, %v346_v36  ;;  %v359_v49 = vmul.f32 %v892_v7, %v339_v45  ;;  %v367_v51 = vmul.f32 %v892_v7, %v347_v46 }
 0x1f8   :  { %v376_v16 = vadd.f32 %v900_v10, %v356_v13  ;;  %v384_v17 = vadd.f32 %v900_v10, %v364_v14  ;;  %v377_v33 = vadd.f32 %v900_v10, %v357_v31  ;;  %v385_v34 = vadd.f32 %v900_v10, %v365_v19 }
 0x1f9   :  { %v378_v43 = vadd.f32 %v900_v10, %v358_v41  ;;  %v386_v44 = vadd.f32 %v900_v10, %v366_v42  ;;  %v379_v52 = vadd.f32 %v900_v10, %v359_v49  ;;  %v387_v53 = vadd.f32 %v900_v10, %v367_v51 }
 0x1fa   :  { %v392_v28 = vmax.f32 %v376_v16, 0.0  ;;  %v400_v30 = vmax.f32 %v384_v17, 0.0  ;;  %v393_v39 = vmax.f32 %v377_v33, 0.0  ;;  %v401_v40 = vmax.f32 %v385_v34, 0.0 }
 0x1fb   :  { %v394_v47 = vmax.f32 %v378_v43, 0.0  ;;  %v402_v48 = vmax.f32 %v386_v44, 0.0  ;;  %v340_v54 = vmul.f32 %v885_v4, %v323_v23  ;;  %v348_v55 = vmul.f32 %v885_v4, %v331_v25 }
 0x1fc   :  { %581 = vmatmul.msk.f32.vlgmr.msra.gmra.mxu1 %vm155_vm1, %v392_v28  ;;  %589 = vmatmul.msk.f32.vlgmr.msra.gmra.mxu2 %vm155_vm1, %v400_v30  ;;  %v395_v56 = vmax.f32 %v379_v52, 0.0  ;;  %v403_v57 = vmax.f32 %v387_v53, 0.0  ;;  %v341_v63 = vmul.f32 %v885_v4, %v324_v24  ;;  %v349_v0 = vmul.f32 %v885_v4, %v332_v27 }
 0x1fd   :  { %v360_v58 = vmul.f32 %v892_v7, %v340_v54  ;;  %v368_v59 = vmul.f32 %v892_v7, %v348_v55  ;;  %v342_v18 = vmul.f32 %v885_v4, %v325_v26  ;;  %v350_v12 = vmul.f32 %v885_v4, %v333_v38 }
 0x1fe   :  { %v361_v6 = vmul.f32 %v892_v7, %v341_v63  ;;  %v369_v8 = vmul.f32 %v892_v7, %v349_v0  ;;  %v343_v28 = vmul.f32 %v885_v4, %v326_v29  ;;  %v351_v30 = vmul.f32 %v885_v4, %v334_v1  ;;  %v996_v4 = vld [vmem:[%s1066_s5] ss:$0 sm:$0xff] }
 0x1ff   :  { %v380_v60 = vadd.f32 %v900_v10, %v360_v58  ;;  %v388_v62 = vadd.f32 %v900_v10, %v368_v59  ;;  %v362_v5 = vmul.f32 %v892_v7, %v342_v18  ;;  %v370_v15 = vmul.f32 %v892_v7, %v350_v12 }
 0x200   :  { %v381_v9 = vadd.f32 %v900_v10, %v361_v6  ;;  %v389_v11 = vadd.f32 %v900_v10, %v369_v8  ;;  %v363_v20 = vmul.f32 %v892_v7, %v343_v28  ;;  %v371_v32 = vmul.f32 %v892_v7, %v351_v30 }
 0x201   :  { %v396_v2 = vmax.f32 %v380_v60, 0.0  ;;  %v404_v3 = vmax.f32 %v388_v62, 0.0  ;;  %v382_v16 = vadd.f32 %v900_v10, %v362_v5  ;;  %v390_v17 = vadd.f32 %v900_v10, %v370_v15 }
 0x202   :  { %v397_v13 = vmax.f32 %v381_v9, 0.0  ;;  %v405_v14 = vmax.f32 %v389_v11, 0.0  ;;  %v383_v50 = vadd.f32 %v900_v10, %v363_v20  ;;  %v391_v37 = vadd.f32 %v900_v10, %v371_v32 }
 0x203   :  { %v398_v31 = vmax.f32 %v382_v16, 0.0  ;;  %v406_v19 = vmax.f32 %v390_v17, 0.0 }
 0x204   :  { %582 = vmatmul.msk.f32.gmra.mxu1 %vm155_vm1, %v393_v39  ;;  %590 = vmatmul.msk.f32.gmra.mxu2 %vm155_vm1, %v401_v40  ;;  %v399_v61 = vmax.f32 %v383_v50, 0.0  ;;  %v407_v33 = vmax.f32 %v391_v37, 0.0 }
 0x20c   :  { %583 = vmatmul.msk.f32.gmra.mxu1 %vm155_vm1, %v394_v47  ;;  %591 = vmatmul.msk.f32.gmra.mxu2 %vm155_vm1, %v402_v48 }
 0x214   :  { %584 = vmatmul.msk.f32.gmra.mxu1 %vm155_vm1, %v395_v56  ;;  %592 = vmatmul.msk.f32.gmra.mxu2 %vm155_vm1, %v403_v57 }
 0x21c   :  { %585 = vmatmul.msk.f32.gmra.mxu1 %vm155_vm1, %v396_v2  ;;  %593 = vmatmul.msk.f32.gmra.mxu2 %vm155_vm1, %v404_v3 }
 0x224   :  { %586 = vmatmul.msk.f32.gmra.mxu1 %vm155_vm1, %v397_v13  ;;  %594 = vmatmul.msk.f32.gmra.mxu2 %vm155_vm1, %v405_v14 }
 0x22c   :  { %587 = vmatmul.msk.f32.gmra.mxu1 %vm155_vm1, %v398_v31  ;;  %595 = vmatmul.msk.f32.gmra.mxu2 %vm155_vm1, %v406_v19 }
 0x234   :  { %588 = vmatmul.msk.f32.gmra.mxu1 %vm155_vm1, %v399_v61  ;;  %596 = vmatmul.msk.f32.gmra.mxu2 %vm155_vm1, %v407_v33 }
 0x279   :  { %v481_v7 = vpop.f32.mrf.mxu1 }
 0x27a   :  { %v482_v34 = vadd.f32 %v996_v4, %v481_v7 }
 0x27c   :  { %614 = vtanh.f32 %v482_v34 }
 0x27f   :  { %v505_v35 = vpop.f32.mrf.mxu2 }
 0x280   :  { %v506_v36 = vadd.f32 %v996_v4, %v505_v35 }
 0x281   :  { %v484_v39 = vpop.f32.mrf.mxu1 }
 0x282   :  { %v615_v10 = vpop.eup %614  ;;  %616 = vtanh.f32 %v506_v36  ;;  %v485_v40 = vadd.f32 %v996_v4, %v484_v39 }
 0x283   :  { %545 = vst [vmem:[%s1068_s6] sm:$0xff] %v615_v10 }
 0x284   :  { %618 = vtanh.f32 %v485_v40 }
 0x287   :  { %v508_v41 = vpop.f32.mrf.mxu2 }
 0x288   :  { %v617_v42 = vpop.eup %616  ;;  %v509_v21 = vadd.f32 %v996_v4, %v508_v41 }
 0x289   :  { %553 = vst [vmem:[%s1068_s6 + $0x40] sm:$0xff] %v617_v42  ;;  %v487_v22 = vpop.f32.mrf.mxu1 }
 0x28a   :  { %v619_v43 = vpop.eup %618  ;;  %620 = vtanh.f32 %v509_v21  ;;  %v488_v44 = vadd.f32 %v996_v4, %v487_v22 }
 0x28b   :  { %546 = vst [vmem:[%s1068_s6 + $0x8] sm:$0xff] %v619_v43 }
 0x28c   :  { %622 = vtanh.f32 %v488_v44 }
 0x28f   :  { %v511_v45 = vpop.f32.mrf.mxu2 }
 0x290   :  { %v621_v46 = vpop.eup %620  ;;  %v512_v47 = vadd.f32 %v996_v4, %v511_v45 }
 0x291   :  { %554 = vst [vmem:[%s1068_s6 + $0x48] sm:$0xff] %v621_v46  ;;  %v490_v48 = vpop.f32.mrf.mxu1 }
 0x292   :  { %v623_v49 = vpop.eup %622  ;;  %624 = vtanh.f32 %v512_v47  ;;  %v491_v51 = vadd.f32 %v996_v4, %v490_v48 }
 0x293   :  { %547 = vst [vmem:[%s1068_s6 + $0x10] sm:$0xff] %v623_v49 }
 0x294   :  { %626 = vtanh.f32 %v491_v51 }
 0x297   :  { %v514_v23 = vpop.f32.mrf.mxu2 }
 0x298   :  { %v625_v25 = vpop.eup %624  ;;  %v515_v52 = vadd.f32 %v996_v4, %v514_v23 }
 0x299   :  { %555 = vst [vmem:[%s1068_s6 + $0x50] sm:$0xff] %v625_v25  ;;  %v493_v53 = vpop.f32.mrf.mxu1 }
 0x29a   :  { %v627_v54 = vpop.eup %626  ;;  %628 = vtanh.f32 %v515_v52  ;;  %v494_v55 = vadd.f32 %v996_v4, %v493_v53 }
 0x29b   :  { %548 = vst [vmem:[%s1068_s6 + $0x18] sm:$0xff] %v627_v54 }
 0x29c   :  { %630 = vtanh.f32 %v494_v55 }
 0x29f   :  { %v517_v56 = vpop.f32.mrf.mxu2 }
 0x2a0   :  { %v629_v57 = vpop.eup %628  ;;  %v518_v58 = vadd.f32 %v996_v4, %v517_v56 }
 0x2a1   :  { %556 = vst [vmem:[%s1068_s6 + $0x58] sm:$0xff] %v629_v57  ;;  %v496_v59 = vpop.f32.mrf.mxu1 }
 0x2a2   :  { %v631_v24 = vpop.eup %630  ;;  %632 = vtanh.f32 %v518_v58  ;;  %v497_v27 = vadd.f32 %v996_v4, %v496_v59 }
 0x2a3   :  { %549 = vst [vmem:[%s1068_s6 + $0x20] sm:$0xff] %v631_v24 }
 0x2a4   :  { %634 = vtanh.f32 %v497_v27 }
 0x2a7   :  { %v520_v60 = vpop.f32.mrf.mxu2 }
 0x2a8   :  { %v633_v62 = vpop.eup %632  ;;  %v521_v63 = vadd.f32 %v996_v4, %v520_v60 }
 0x2a9   :  { %557 = vst [vmem:[%s1068_s6 + $0x60] sm:$0xff] %v633_v62  ;;  %v499_v0 = vpop.f32.mrf.mxu1 }
 0x2aa   :  { %v635_v2 = vpop.eup %634  ;;  %636 = vtanh.f32 %v521_v63  ;;  %v500_v3 = vadd.f32 %v996_v4, %v499_v0 }
 0x2ab   :  { %550 = vst [vmem:[%s1068_s6 + $0x28] sm:$0xff] %v635_v2 }
 0x2ac   :  { %638 = vtanh.f32 %v500_v3 }
 0x2af   :  { %v523_v6 = vpop.f32.mrf.mxu2 }
 0x2b0   :  { %v637_v8 = vpop.eup %636  ;;  %v524_v26 = vadd.f32 %v996_v4, %v523_v6 }
 0x2b1   :  { %558 = vst [vmem:[%s1068_s6 + $0x68] sm:$0xff] %v637_v8  ;;  %v502_v38 = vpop.f32.mrf.mxu1 }
 0x2b2   :  { %v639_v9 = vpop.eup %638  ;;  %640 = vtanh.f32 %v524_v26  ;;  %v503_v11 = vadd.f32 %v996_v4, %v502_v38 }
 0x2b3   :  { %551 = vst [vmem:[%s1068_s6 + $0x30] sm:$0xff] %v639_v9 }
 0x2b4   :  { %642 = vtanh.f32 %v503_v11 }
 0x2b7   :  { %v526_v18 = vpop.f32.mrf.mxu2 }
 0x2b8   :  { %v641_v12 = vpop.eup %640  ;;  %v527_v13 = vadd.f32 %v996_v4, %v526_v18 }
 0x2b9   :  { %559 = vst [vmem:[%s1068_s6 + $0x70] sm:$0xff] %v641_v12 }
 0x2ba   :  { %v643_v14 = vpop.eup %642  ;;  %644 = vtanh.f32 %v527_v13 }
 0x2bb   :  { %552 = vst [vmem:[%s1068_s6 + $0x38] sm:$0xff] %v643_v14 }
 0x2c0   :  { %v645_v5 = vpop.eup %644 }
 0x2c1   :  { %560 = vst [vmem:[%s1068_s6 + $0x78] sm:$0xff] %v645_v5 }

</bundles_post_ra>
